<compile_context>
chip_gen: v6e
topology: v6e:2x2x1
jax: 0.10.0
libtpu: 0.0.40
codegen_flags: <defaults>
</compile_context>

<pallas_src>
import functools

import jax
import jax.numpy as jnp
from jax.experimental import pallas as pl
from jax.experimental.pallas import tpu as pltpu

PARAMS = {
    "factor": 2,
    "filters": 32,
    "kernel size": 3,        # kernel assumes 3 (padding = 1)
    "layers": 3,             # conv1 + (layers-2) mid convs + conv_out
    "state dimension": 8,
}

_PAD = 128   # lane zero-pad on the flattened spatial axis (>= W+1, 128-aligned)


# ------------------------------- fused kernel --------------------------------

def _rlsp_kernel(x_ref, w_ref, b_ref, out_ref, *, W, T, L, F2, SD, FILT):
    """One grid step == one batch element, full T-step recurrence in-kernel.

    x_ref:   (T, 3, HW)        f32   all frames of this batch element
    w_ref:   (L, 9, FILT, FILT) bf16 per-layer, per-tap weights (tap = kh*3+kw)
    b_ref:   (L, FILT, HW)     f32   biases pre-broadcast to lane width
    out_ref: (T, 3*F2, HW)     f32   pre-shuffle outputs (== feedback)
    """
    HW = x_ref.shape[-1]
    n_real = 9 + 3 * F2 + SD                       # real conv1 input channels

    # ---- loop-invariant constants (hoisted out of the time loop) ------------
    col = jax.lax.broadcasted_iota(jnp.int32, (1, HW), 1) % W
    mask_l = col >= 1                              # dw == -1 taps: col 0 invalid
    mask_r = col <= W - 2                          # dw == +1 taps: col W-1 invalid
    zpad = jnp.zeros((FILT, _PAD), jnp.bfloat16)   # row OOB reads land here (=0)
    zrows = (jnp.zeros((FILT - n_real, HW), jnp.float32)
             if FILT > n_real else None)

    def conv(a_b16, layer, relu):
        # a_b16: (FILT, HW) bf16  ->  (FILT, HW) f32
        # Zero lane-pad once; 9 lane-shifted views feed 9 tap matmuls that
        # accumulate (f32) on top of the bias -- no xcol materialization.
        apad = jnp.concatenate([zpad, a_b16, zpad], axis=1)   # (FILT, HW+2*_PAD)
        acc = b_ref[layer]                                     # bias-initialized
        for kh in range(3):
            for kw in range(3):
                d = (kh - 1) * W + (kw - 1)
                s = apad[:, _PAD + d:_PAD + d + HW]            # shifted view
                if kw == 0:
                    s = jnp.where(mask_l, s, jnp.zeros_like(s))
                elif kw == 2:
                    s = jnp.where(mask_r, s, jnp.zeros_like(s))
                acc = acc + jnp.dot(w_ref[layer, kh * 3 + kw], s,
                                    preferred_element_type=jnp.float32)
        return jnp.maximum(acc, 0.0) if relu else acc

    def step(t, carry):
        fb, st = carry                                         # (3*F2,HW)/(SD,HW) f32
        tp = jnp.maximum(t - 1, 0)                             # clamped neighbours
        tn = jnp.minimum(t + 1, T - 1)                         # (matches PyTorch)
        f_cur = x_ref[t]                                       # (3, HW) f32

        pieces = [x_ref[tp], f_cur, x_ref[tn], fb, st]
        if zrows is not None:
            pieces.append(zrows)
        a = jnp.concatenate(pieces, axis=0).astype(jnp.bfloat16)   # (FILT, HW)

        for l in range(L - 1):                                 # conv1 + mid convs
            a = conv(a, l, relu=True).astype(jnp.bfloat16)
        y = conv(a, L - 1, relu=False)                         # conv_out, f32

        # epilogue: residual add (pre-shuffle), state ReLU, carry update
        rgb = y[:3 * F2] + jnp.concatenate([f_cur] * F2, axis=0)
        st_new = jnp.maximum(y[3 * F2:3 * F2 + SD], 0.0)
        out_ref[t] = rgb
        return rgb, st_new

    fb0 = jnp.zeros((3 * F2, HW), jnp.float32)
    st0 = jnp.zeros((SD, HW), jnp.float32)
    jax.lax.fori_loop(0, T, step, (fb0, st0))


# --------------------------- weights (raw + packed) ---------------------------

def init_weights(key):
    """PyTorch-style init; returns raw per-layer (w (Cout,Cin,3,3), b (Cout,))."""
    f = PARAMS["factor"]
    filt = PARAMS["filters"]
    sd = PARAMS["state dimension"]
    layers = PARAMS["layers"]
    cins = [3 * 3 + 3 * f ** 2 + sd] + [filt] * (layers - 1)
    couts = [filt] * (layers - 1) + [3 * f ** 2 + sd]
    assert filt >= cins[0] and filt >= couts[-1]

    raw = []
    for k, cin, cout in zip(jax.random.split(key, layers), cins, couts):
        kw_, kb_ = jax.random.split(k)
        bound = 1.0 / (cin * 9) ** 0.5
        w = jax.random.uniform(kw_, (cout, cin, 3, 3), jnp.float32, -bound, bound)
        b = jax.random.uniform(kb_, (cout,), jnp.float32, -bound, bound)
        raw.append((w, b))
    return raw


def pack_weights(raw):
    """-> w_all (L, 9, FILT, FILT) bf16 (tap = kh*3+kw), b_all (L, FILT) f32."""
    filt = PARAMS["filters"]
    ws, bs = [], []
    for w, b in raw:
        cout, cin = w.shape[0], w.shape[1]
        wt = jnp.transpose(w, (2, 3, 0, 1)).reshape(9, cout, cin)   # [tap, co, ci]
        wp = jnp.zeros((9, filt, filt), jnp.float32).at[:, :cout, :cin].set(wt)
        bp = jnp.zeros((filt,), jnp.float32).at[:cout].set(b)
        ws.append(wp)
        bs.append(bp)
    return jnp.stack(ws).astype(jnp.bfloat16), jnp.stack(bs)


# ----------------------------------- forward ----------------------------------

def _shuffle_up(seq, f):
    # (B, T, 3*f*f, H, W) -> (B, T, 3, f*H, f*W).  Channel grouping (fh, fw, c),
    # consistent with the reference's res.repeat(1, f^2, 1, 1) residual layout.
    # TODO(synk): permute conv_out channels if loading a torch.nn.PixelShuffle
    # (c, fh, fw)-convention trained checkpoint.
    B, T, C, H, W = seq.shape
    y = seq.reshape(B, T, f, f, C // (f * f), H, W)
    y = jnp.transpose(y, (0, 1, 4, 5, 2, 6, 3))
    return y.reshape(B, T, C // (f * f), f * H, f * W)


@jax.jit
def rlsp_forward(w_all, b_all, x):
    # x: (B, T, 3, H, W) -> (B, T, 3, f*H, f*W)
    B, T, C, H, W = x.shape
    f = PARAMS["factor"]
    F2 = f * f
    SD = PARAMS["state dimension"]
    FILT = PARAMS["filters"]
    L = PARAMS["layers"]
    HW = H * W

    x_r = x.reshape(B, T, C, HW)                             # lane-dense frames
    b_bc = jnp.broadcast_to(b_all[:, :, None], (L, FILT, HW)).astype(jnp.float32)

    kernel = functools.partial(_rlsp_kernel, W=W, T=T, L=L, F2=F2, SD=SD,
                               FILT=FILT)

    out_flat = pl.pallas_call(
        kernel,
        out_shape=jax.ShapeDtypeStruct((B, T, 3 * F2, HW), jnp.float32),
        grid=(B,),
        in_specs=[
            # full time slab of one batch element (tiny: T * 3 KB), read once
            pl.BlockSpec((None, T, C, HW), lambda b: (b, 0, 0, 0)),
            # all layer weights / biases stay VMEM-resident (constant index)
            pl.BlockSpec((L, 9, FILT, FILT), lambda b: (0, 0, 0, 0)),
            pl.BlockSpec((L, FILT, HW), lambda b: (0, 0, 0)),
        ],
        out_specs=pl.BlockSpec((None, T, 3 * F2, HW), lambda b: (b, 0, 0, 0)),
        compiler_params=pltpu.CompilerParams(
            dimension_semantics=("parallel",)),
    )(x_r, w_all, b_bc)

    return _shuffle_up(out_flat.reshape(B, T, 3 * F2, H, W), f)


# ----------------------------- pure-JAX reference -----------------------------

def _ref_forward(raw, x):
    """f32 reference of the RLSP forward (pre-shuffle outputs)."""
    f = PARAMS["factor"]
    F2 = f * f
    SD = PARAMS["state dimension"]
    B, T, C, H, W = x.shape
    dn = ("NCHW", "OIHW", "NCHW")
    fb = jnp.zeros((B, 3 * F2, H, W), jnp.float32)
    st = jnp.zeros((B, SD, H, W), jnp.float32)
    outs = []
    for t in range(T):
        tp, tn = max(t - 1, 0), min(t + 1, T - 1)
        a = jnp.concatenate([x[:, tp], x[:, t], x[:, tn], fb, st], axis=1)
        for i, (w, b) in enumerate(raw):
            a = jax.lax.conv_general_dilated(a, w, (1, 1), "SAME",
                                             dimension_numbers=dn)
            a = a + b[None, :, None, None]
            if i < len(raw) - 1:
                a = jnp.maximum(a, 0.0)
        rgb = a[:, :3 * F2] + jnp.tile(x[:, t], (1, F2, 1, 1))
        st = jnp.maximum(a[:, 3 * F2:3 * F2 + SD], 0.0)
        fb = rgb
        outs.append(rgb)
    return jnp.stack(outs, axis=1)           # (B, T, 3*F2, H, W)


# ------------------------------------ main ------------------------------------

if __name__ == "__main__":
    B, T, C, H, W = 2, 3, 3, 16, 16
    key = jax.random.PRNGKey(0)
    k_x, k_w = jax.random.split(key)
    x = jax.random.normal(k_x, (B, T, C, H, W), jnp.float32)

    raw = init_weights(k_w)
    w_all, b_all = pack_weights(raw)

    y = rlsp_forward(w_all, b_all, x)
    jax.block_until_ready(y)

    f = PARAMS["factor"]
    assert y.shape == (B, T, C, f * H, f * W), y.shape
    assert bool(jnp.all(jnp.isfinite(y)))

    # Correctness vs. f32 reference (kernel uses bf16 weights/activations with
    # f32 accumulation, so allow a generous tolerance).
    y_ref = _shuffle_up(_ref_forward(raw, x), f)
    err = float(jnp.max(jnp.abs(y - y_ref)))
    assert err < 0.25, f"max abs err too large: {err}"

    print("KERNEL_OK")
</pallas_src>

<mosaic_0001>
module attributes {stable_mosaic.version = 11 : i64} {
  func.func @_rlsp_kernel(%arg0: i32, %arg1: memref<1x3x3x256xf32, #tpu.memory_space<vmem>>, %arg2: memref<3x9x32x32xbf16, #tpu.memory_space<vmem>>, %arg3: memref<3x32x256xf32, #tpu.memory_space<vmem>>, %arg4: memref<1x3x12x256xf32, #tpu.memory_space<vmem>>) attributes {dimension_semantics = [#tpu.dimension_semantics<parallel>], iteration_bounds = array<i64: 2>, scalar_prefetch = 0 : i64, scratch_operands = 0 : i64, tpu.core_type = #tpu.core_type<tc>, window_params = [{transform_indices = @transform_0, window_bounds = array<i64: 1, 3, 3, 256>}, {pipeline_mode = #tpu.pipeline_mode<synchronous>, transform_indices = @transform_1, window_bounds = array<i64: 3, 9, 32, 32>}, {pipeline_mode = #tpu.pipeline_mode<synchronous>, transform_indices = @transform_2, window_bounds = array<i64: 3, 32, 256>}, {transform_indices = @transform_3, window_bounds = array<i64: 1, 3, 12, 256>}]} {
    %0 = tpu.iota {dimensions = array<i32: 1>} : vector<1x256xi32>
    %c16_i32 = arith.constant 16 : i32
    %c0_i32 = arith.constant 0 : i32
    %1 = arith.cmpi eq, %c16_i32, %c0_i32 : i32
    %c1_i32 = arith.constant 1 : i32
    %2 = arith.select %1, %c1_i32, %c16_i32 : i32
    %3 = vector.broadcast %2 : i32 to vector<1x256xi32>
    %4 = arith.remsi %0, %3 : vector<1x256xi32>
    %c0_i32_0 = arith.constant 0 : i32
    %5 = vector.broadcast %c0_i32_0 : i32 to vector<1x256xi32>
    %6 = arith.cmpi ne, %4, %5 : vector<1x256xi32>
    %c0_i32_1 = arith.constant 0 : i32
    %7 = vector.broadcast %c0_i32_1 : i32 to vector<1x256xi32>
    %8 = arith.cmpi slt, %4, %7 : vector<1x256xi32>
    %c0_i32_2 = arith.constant 0 : i32
    %9 = arith.cmpi slt, %2, %c0_i32_2 : i32
    %10 = vector.broadcast %9 : i1 to vector<1x256xi1>
    %11 = vector.broadcast %10 : vector<1x256xi1> to vector<1x256xi1>
    %12 = arith.xori %8, %11 : vector<1x256xi1>
    %13 = arith.andi %12, %6 : vector<1x256xi1>
    %14 = vector.broadcast %2 : i32 to vector<1x256xi32>
    %15 = arith.addi %4, %14 : vector<1x256xi32>
    %16 = arith.select %13, %15, %4 : vector<1x256xi1>, vector<1x256xi32>
    %c1_i32_3 = arith.constant 1 : i32
    %17 = vector.broadcast %c1_i32_3 : i32 to vector<1x256xi32>
    %18 = arith.cmpi sge, %16, %17 : vector<1x256xi32>
    %c14_i32 = arith.constant 14 : i32
    %19 = vector.broadcast %c14_i32 : i32 to vector<1x256xi32>
    %20 = arith.cmpi sle, %16, %19 : vector<1x256xi32>
    %cst = arith.constant 0.000000e+00 : bf16
    %21 = vector.broadcast %cst : bf16 to vector<32x128xbf16>
    %cst_4 = arith.constant 0.000000e+00 : f32
    %22 = vector.broadcast %cst_4 : f32 to vector<3x256xf32>
    %cst_5 = arith.constant 0.000000e+00 : f32
    %23 = vector.broadcast %cst_5 : f32 to vector<12x256xf32>
    %cst_6 = arith.constant 0.000000e+00 : f32
    %24 = vector.broadcast %cst_6 : f32 to vector<8x256xf32>
    %c0_i32_7 = arith.constant 0 : i32
    %c3_i32 = arith.constant 3 : i32
    %25 = arith.addi %c0_i32_7, %c3_i32 : i32
    %c1_i32_8 = arith.constant 1 : i32
    %26:2 = scf.for %arg5 = %c0_i32_7 to %25 step %c1_i32_8 iter_args(%arg6 = %23, %arg7 = %24) -> (vector<12x256xf32>, vector<8x256xf32>)  : i32 {
      %c1_i32_10 = arith.constant 1 : i32
      %27 = arith.subi %arg5, %c1_i32_10 : i32
      %c0_i32_11 = arith.constant 0 : i32
      %28 = arith.maxsi %27, %c0_i32_11 : i32
      %c1_i32_12 = arith.constant 1 : i32
      %29 = arith.addi %arg5, %c1_i32_12 : i32
      %c2_i32 = arith.constant 2 : i32
      %30 = arith.minsi %29, %c2_i32 : i32
      %c0 = arith.constant 0 : index
      %31 = arith.index_cast %arg5 : i32 to index
      %c0_13 = arith.constant 0 : index
      %c0_14 = arith.constant 0 : index
      %32 = vector.load %arg1[%c0, %31, %c0_13, %c0_14] : memref<1x3x3x256xf32, #tpu.memory_space<vmem>>, vector<1x1x3x256xf32>
      %33 = vector.shape_cast %32 : vector<1x1x3x256xf32> to vector<3x256xf32>
      %c0_15 = arith.constant 0 : index
      %34 = arith.index_cast %28 : i32 to index
      %c0_16 = arith.constant 0 : index
      %c0_17 = arith.constant 0 : index
      %35 = vector.load %arg1[%c0_15, %34, %c0_16, %c0_17] : memref<1x3x3x256xf32, #tpu.memory_space<vmem>>, vector<1x1x3x256xf32>
      %36 = vector.shape_cast %35 : vector<1x1x3x256xf32> to vector<3x256xf32>
      %c0_18 = arith.constant 0 : index
      %37 = arith.index_cast %30 : i32 to index
      %c0_19 = arith.constant 0 : index
      %c0_20 = arith.constant 0 : index
      %38 = vector.load %arg1[%c0_18, %37, %c0_19, %c0_20] : memref<1x3x3x256xf32, #tpu.memory_space<vmem>>, vector<1x1x3x256xf32>
      %39 = vector.shape_cast %38 : vector<1x1x3x256xf32> to vector<3x256xf32>
      %40 = tpu.concatenate %36, %33, %39, %arg6, %arg7, %22 in 0 : vector<3x256xf32>, vector<3x256xf32>, vector<3x256xf32>, vector<12x256xf32>, vector<8x256xf32>, vector<3x256xf32> -> vector<32x256xf32>
      %41 = arith.truncf %40 : vector<32x256xf32> to vector<32x256xbf16>
      %42 = tpu.concatenate %21, %41, %21 in 1 : vector<32x128xbf16>, vector<32x256xbf16>, vector<32x128xbf16> -> vector<32x512xbf16>
      %c0_21 = arith.constant 0 : index
      %c0_22 = arith.constant 0 : index
      %c0_23 = arith.constant 0 : index
      %43 = vector.load %arg3[%c0_21, %c0_22, %c0_23] : memref<3x32x256xf32, #tpu.memory_space<vmem>>, vector<1x32x256xf32>
      %44 = vector.shape_cast %43 : vector<1x32x256xf32> to vector<32x256xf32>
      %45 = vector.extract_strided_slice %42 {offsets = [0, 111], sizes = [32, 256], strides = [1, 1]} : vector<32x512xbf16> to vector<32x256xbf16>
      %cst_24 = arith.constant 0.000000e+00 : bf16
      %46 = vector.broadcast %cst_24 : bf16 to vector<32x256xbf16>
      %47 = vector.shape_cast %18 : vector<1x256xi1> to vector<1x256xi1>
      %48 = vector.broadcast %47 : vector<1x256xi1> to vector<32x256xi1>
      %49 = arith.select %48, %45, %46 : vector<32x256xi1>, vector<32x256xbf16>
      %c0_25 = arith.constant 0 : index
      %c0_26 = arith.constant 0 : index
      %c0_27 = arith.constant 0 : index
      %c0_28 = arith.constant 0 : index
      %50 = vector.load %arg2[%c0_25, %c0_26, %c0_27, %c0_28] : memref<3x9x32x32xbf16, #tpu.memory_space<vmem>>, vector<1x1x32x32xbf16>
      %51 = vector.shape_cast %50 : vector<1x1x32x32xbf16> to vector<32x32xbf16>
      %cst_29 = arith.constant dense<0.000000e+00> : vector<32x256xf32>
      %52 = tpu.matmul %51, %49, %cst_29 {dimension_numbers = #tpu.dot_dimension_numbers<[1], [0], [0], [1], [0, 0, 1, 1], [], []>} : vector<32x32xbf16>, vector<32x256xbf16>, vector<32x256xf32> -> vector<32x256xf32>
      %53 = arith.addf %44, %52 : vector<32x256xf32>
      %54 = vector.extract_strided_slice %42 {offsets = [0, 112], sizes = [32, 256], strides = [1, 1]} : vector<32x512xbf16> to vector<32x256xbf16>
      %c0_30 = arith.constant 0 : index
      %c1 = arith.constant 1 : index
      %c0_31 = arith.constant 0 : index
      %c0_32 = arith.constant 0 : index
      %55 = vector.load %arg2[%c0_30, %c1, %c0_31, %c0_32] : memref<3x9x32x32xbf16, #tpu.memory_space<vmem>>, vector<1x1x32x32xbf16>
      %56 = vector.shape_cast %55 : vector<1x1x32x32xbf16> to vector<32x32xbf16>
      %cst_33 = arith.constant dense<0.000000e+00> : vector<32x256xf32>
      %57 = tpu.matmul %56, %54, %cst_33 {dimension_numbers = #tpu.dot_dimension_numbers<[1], [0], [0], [1], [0, 0, 1, 1], [], []>} : vector<32x32xbf16>, vector<32x256xbf16>, vector<32x256xf32> -> vector<32x256xf32>
      %58 = arith.addf %53, %57 : vector<32x256xf32>
      %59 = vector.extract_strided_slice %42 {offsets = [0, 113], sizes = [32, 256], strides = [1, 1]} : vector<32x512xbf16> to vector<32x256xbf16>
      %cst_34 = arith.constant 0.000000e+00 : bf16
      %60 = vector.broadcast %cst_34 : bf16 to vector<32x256xbf16>
      %61 = vector.shape_cast %20 : vector<1x256xi1> to vector<1x256xi1>
      %62 = vector.broadcast %61 : vector<1x256xi1> to vector<32x256xi1>
      %63 = arith.select %62, %59, %60 : vector<32x256xi1>, vector<32x256xbf16>
      %c0_35 = arith.constant 0 : index
      %c2 = arith.constant 2 : index
      %c0_36 = arith.constant 0 : index
      %c0_37 = arith.constant 0 : index
      %64 = vector.load %arg2[%c0_35, %c2, %c0_36, %c0_37] : memref<3x9x32x32xbf16, #tpu.memory_space<vmem>>, vector<1x1x32x32xbf16>
      %65 = vector.shape_cast %64 : vector<1x1x32x32xbf16> to vector<32x32xbf16>
      %cst_38 = arith.constant dense<0.000000e+00> : vector<32x256xf32>
      %66 = tpu.matmul %65, %63, %cst_38 {dimension_numbers = #tpu.dot_dimension_numbers<[1], [0], [0], [1], [0, 0, 1, 1], [], []>} : vector<32x32xbf16>, vector<32x256xbf16>, vector<32x256xf32> -> vector<32x256xf32>
      %67 = arith.addf %58, %66 : vector<32x256xf32>
      %68 = vector.extract_strided_slice %42 {offsets = [0, 127], sizes = [32, 256], strides = [1, 1]} : vector<32x512xbf16> to vector<32x256xbf16>
      %cst_39 = arith.constant 0.000000e+00 : bf16
      %69 = vector.broadcast %cst_39 : bf16 to vector<32x256xbf16>
      %70 = vector.shape_cast %18 : vector<1x256xi1> to vector<1x256xi1>
      %71 = vector.broadcast %70 : vector<1x256xi1> to vector<32x256xi1>
      %72 = arith.select %71, %68, %69 : vector<32x256xi1>, vector<32x256xbf16>
      %c0_40 = arith.constant 0 : index
      %c3 = arith.constant 3 : index
      %c0_41 = arith.constant 0 : index
      %c0_42 = arith.constant 0 : index
      %73 = vector.load %arg2[%c0_40, %c3, %c0_41, %c0_42] : memref<3x9x32x32xbf16, #tpu.memory_space<vmem>>, vector<1x1x32x32xbf16>
      %74 = vector.shape_cast %73 : vector<1x1x32x32xbf16> to vector<32x32xbf16>
      %cst_43 = arith.constant dense<0.000000e+00> : vector<32x256xf32>
      %75 = tpu.matmul %74, %72, %cst_43 {dimension_numbers = #tpu.dot_dimension_numbers<[1], [0], [0], [1], [0, 0, 1, 1], [], []>} : vector<32x32xbf16>, vector<32x256xbf16>, vector<32x256xf32> -> vector<32x256xf32>
      %76 = arith.addf %67, %75 : vector<32x256xf32>
      %77 = vector.extract_strided_slice %42 {offsets = [0, 128], sizes = [32, 256], strides = [1, 1]} : vector<32x512xbf16> to vector<32x256xbf16>
      %c0_44 = arith.constant 0 : index
      %c4 = arith.constant 4 : index
      %c0_45 = arith.constant 0 : index
      %c0_46 = arith.constant 0 : index
      %78 = vector.load %arg2[%c0_44, %c4, %c0_45, %c0_46] : memref<3x9x32x32xbf16, #tpu.memory_space<vmem>>, vector<1x1x32x32xbf16>
      %79 = vector.shape_cast %78 : vector<1x1x32x32xbf16> to vector<32x32xbf16>
      %cst_47 = arith.constant dense<0.000000e+00> : vector<32x256xf32>
      %80 = tpu.matmul %79, %77, %cst_47 {dimension_numbers = #tpu.dot_dimension_numbers<[1], [0], [0], [1], [0, 0, 1, 1], [], []>} : vector<32x32xbf16>, vector<32x256xbf16>, vector<32x256xf32> -> vector<32x256xf32>
      %81 = arith.addf %76, %80 : vector<32x256xf32>
      %82 = vector.extract_strided_slice %42 {offsets = [0, 129], sizes = [32, 256], strides = [1, 1]} : vector<32x512xbf16> to vector<32x256xbf16>
      %cst_48 = arith.constant 0.000000e+00 : bf16
      %83 = vector.broadcast %cst_48 : bf16 to vector<32x256xbf16>
      %84 = vector.shape_cast %20 : vector<1x256xi1> to vector<1x256xi1>
      %85 = vector.broadcast %84 : vector<1x256xi1> to vector<32x256xi1>
      %86 = arith.select %85, %82, %83 : vector<32x256xi1>, vector<32x256xbf16>
      %c0_49 = arith.constant 0 : index
      %c5 = arith.constant 5 : index
      %c0_50 = arith.constant 0 : index
      %c0_51 = arith.constant 0 : index
      %87 = vector.load %arg2[%c0_49, %c5, %c0_50, %c0_51] : memref<3x9x32x32xbf16, #tpu.memory_space<vmem>>, vector<1x1x32x32xbf16>
      %88 = vector.shape_cast %87 : vector<1x1x32x32xbf16> to vector<32x32xbf16>
      %cst_52 = arith.constant dense<0.000000e+00> : vector<32x256xf32>
      %89 = tpu.matmul %88, %86, %cst_52 {dimension_numbers = #tpu.dot_dimension_numbers<[1], [0], [0], [1], [0, 0, 1, 1], [], []>} : vector<32x32xbf16>, vector<32x256xbf16>, vector<32x256xf32> -> vector<32x256xf32>
      %90 = arith.addf %81, %89 : vector<32x256xf32>
      %91 = vector.extract_strided_slice %42 {offsets = [0, 143], sizes = [32, 256], strides = [1, 1]} : vector<32x512xbf16> to vector<32x256xbf16>
      %cst_53 = arith.constant 0.000000e+00 : bf16
      %92 = vector.broadcast %cst_53 : bf16 to vector<32x256xbf16>
      %93 = vector.shape_cast %18 : vector<1x256xi1> to vector<1x256xi1>
      %94 = vector.broadcast %93 : vector<1x256xi1> to vector<32x256xi1>
      %95 = arith.select %94, %91, %92 : vector<32x256xi1>, vector<32x256xbf16>
      %c0_54 = arith.constant 0 : index
      %c6 = arith.constant 6 : index
      %c0_55 = arith.constant 0 : index
      %c0_56 = arith.constant 0 : index
      %96 = vector.load %arg2[%c0_54, %c6, %c0_55, %c0_56] : memref<3x9x32x32xbf16, #tpu.memory_space<vmem>>, vector<1x1x32x32xbf16>
      %97 = vector.shape_cast %96 : vector<1x1x32x32xbf16> to vector<32x32xbf16>
      %cst_57 = arith.constant dense<0.000000e+00> : vector<32x256xf32>
      %98 = tpu.matmul %97, %95, %cst_57 {dimension_numbers = #tpu.dot_dimension_numbers<[1], [0], [0], [1], [0, 0, 1, 1], [], []>} : vector<32x32xbf16>, vector<32x256xbf16>, vector<32x256xf32> -> vector<32x256xf32>
      %99 = arith.addf %90, %98 : vector<32x256xf32>
      %100 = vector.extract_strided_slice %42 {offsets = [0, 144], sizes = [32, 256], strides = [1, 1]} : vector<32x512xbf16> to vector<32x256xbf16>
      %c0_58 = arith.constant 0 : index
      %c7 = arith.constant 7 : index
      %c0_59 = arith.constant 0 : index
      %c0_60 = arith.constant 0 : index
      %101 = vector.load %arg2[%c0_58, %c7, %c0_59, %c0_60] : memref<3x9x32x32xbf16, #tpu.memory_space<vmem>>, vector<1x1x32x32xbf16>
      %102 = vector.shape_cast %101 : vector<1x1x32x32xbf16> to vector<32x32xbf16>
      %cst_61 = arith.constant dense<0.000000e+00> : vector<32x256xf32>
      %103 = tpu.matmul %102, %100, %cst_61 {dimension_numbers = #tpu.dot_dimension_numbers<[1], [0], [0], [1], [0, 0, 1, 1], [], []>} : vector<32x32xbf16>, vector<32x256xbf16>, vector<32x256xf32> -> vector<32x256xf32>
      %104 = arith.addf %99, %103 : vector<32x256xf32>
      %105 = vector.extract_strided_slice %42 {offsets = [0, 145], sizes = [32, 256], strides = [1, 1]} : vector<32x512xbf16> to vector<32x256xbf16>
      %cst_62 = arith.constant 0.000000e+00 : bf16
      %106 = vector.broadcast %cst_62 : bf16 to vector<32x256xbf16>
      %107 = vector.shape_cast %20 : vector<1x256xi1> to vector<1x256xi1>
      %108 = vector.broadcast %107 : vector<1x256xi1> to vector<32x256xi1>
      %109 = arith.select %108, %105, %106 : vector<32x256xi1>, vector<32x256xbf16>
      %c0_63 = arith.constant 0 : index
      %c8 = arith.constant 8 : index
      %c0_64 = arith.constant 0 : index
      %c0_65 = arith.constant 0 : index
      %110 = vector.load %arg2[%c0_63, %c8, %c0_64, %c0_65] : memref<3x9x32x32xbf16, #tpu.memory_space<vmem>>, vector<1x1x32x32xbf16>
      %111 = vector.shape_cast %110 : vector<1x1x32x32xbf16> to vector<32x32xbf16>
      %cst_66 = arith.constant dense<0.000000e+00> : vector<32x256xf32>
      %112 = tpu.matmul %111, %109, %cst_66 {dimension_numbers = #tpu.dot_dimension_numbers<[1], [0], [0], [1], [0, 0, 1, 1], [], []>} : vector<32x32xbf16>, vector<32x256xbf16>, vector<32x256xf32> -> vector<32x256xf32>
      %113 = arith.addf %104, %112 : vector<32x256xf32>
      %cst_67 = arith.constant 0.000000e+00 : f32
      %114 = vector.broadcast %cst_67 : f32 to vector<32x256xf32>
      %115 = arith.maximumf %113, %114 : vector<32x256xf32>
      %116 = arith.truncf %115 : vector<32x256xf32> to vector<32x256xbf16>
      %117 = tpu.concatenate %21, %116, %21 in 1 : vector<32x128xbf16>, vector<32x256xbf16>, vector<32x128xbf16> -> vector<32x512xbf16>
      %c1_68 = arith.constant 1 : index
      %c0_69 = arith.constant 0 : index
      %c0_70 = arith.constant 0 : index
      %118 = vector.load %arg3[%c1_68, %c0_69, %c0_70] : memref<3x32x256xf32, #tpu.memory_space<vmem>>, vector<1x32x256xf32>
      %119 = vector.shape_cast %118 : vector<1x32x256xf32> to vector<32x256xf32>
      %120 = vector.extract_strided_slice %117 {offsets = [0, 111], sizes = [32, 256], strides = [1, 1]} : vector<32x512xbf16> to vector<32x256xbf16>
      %cst_71 = arith.constant 0.000000e+00 : bf16
      %121 = vector.broadcast %cst_71 : bf16 to vector<32x256xbf16>
      %122 = vector.shape_cast %18 : vector<1x256xi1> to vector<1x256xi1>
      %123 = vector.broadcast %122 : vector<1x256xi1> to vector<32x256xi1>
      %124 = arith.select %123, %120, %121 : vector<32x256xi1>, vector<32x256xbf16>
      %c1_72 = arith.constant 1 : index
      %c0_73 = arith.constant 0 : index
      %c0_74 = arith.constant 0 : index
      %c0_75 = arith.constant 0 : index
      %125 = vector.load %arg2[%c1_72, %c0_73, %c0_74, %c0_75] : memref<3x9x32x32xbf16, #tpu.memory_space<vmem>>, vector<1x1x32x32xbf16>
      %126 = vector.shape_cast %125 : vector<1x1x32x32xbf16> to vector<32x32xbf16>
      %cst_76 = arith.constant dense<0.000000e+00> : vector<32x256xf32>
      %127 = tpu.matmul %126, %124, %cst_76 {dimension_numbers = #tpu.dot_dimension_numbers<[1], [0], [0], [1], [0, 0, 1, 1], [], []>} : vector<32x32xbf16>, vector<32x256xbf16>, vector<32x256xf32> -> vector<32x256xf32>
      %128 = arith.addf %119, %127 : vector<32x256xf32>
      %129 = vector.extract_strided_slice %117 {offsets = [0, 112], sizes = [32, 256], strides = [1, 1]} : vector<32x512xbf16> to vector<32x256xbf16>
      %c1_77 = arith.constant 1 : index
      %c1_78 = arith.constant 1 : index
      %c0_79 = arith.constant 0 : index
      %c0_80 = arith.constant 0 : index
      %130 = vector.load %arg2[%c1_77, %c1_78, %c0_79, %c0_80] : memref<3x9x32x32xbf16, #tpu.memory_space<vmem>>, vector<1x1x32x32xbf16>
      %131 = vector.shape_cast %130 : vector<1x1x32x32xbf16> to vector<32x32xbf16>
      %cst_81 = arith.constant dense<0.000000e+00> : vector<32x256xf32>
      %132 = tpu.matmul %131, %129, %cst_81 {dimension_numbers = #tpu.dot_dimension_numbers<[1], [0], [0], [1], [0, 0, 1, 1], [], []>} : vector<32x32xbf16>, vector<32x256xbf16>, vector<32x256xf32> -> vector<32x256xf32>
      %133 = arith.addf %128, %132 : vector<32x256xf32>
      %134 = vector.extract_strided_slice %117 {offsets = [0, 113], sizes = [32, 256], strides = [1, 1]} : vector<32x512xbf16> to vector<32x256xbf16>
      %cst_82 = arith.constant 0.000000e+00 : bf16
      %135 = vector.broadcast %cst_82 : bf16 to vector<32x256xbf16>
      %136 = vector.shape_cast %20 : vector<1x256xi1> to vector<1x256xi1>
      %137 = vector.broadcast %136 : vector<1x256xi1> to vector<32x256xi1>
      %138 = arith.select %137, %134, %135 : vector<32x256xi1>, vector<32x256xbf16>
      %c1_83 = arith.constant 1 : index
      %c2_84 = arith.constant 2 : index
      %c0_85 = arith.constant 0 : index
      %c0_86 = arith.constant 0 : index
      %139 = vector.load %arg2[%c1_83, %c2_84, %c0_85, %c0_86] : memref<3x9x32x32xbf16, #tpu.memory_space<vmem>>, vector<1x1x32x32xbf16>
      %140 = vector.shape_cast %139 : vector<1x1x32x32xbf16> to vector<32x32xbf16>
      %cst_87 = arith.constant dense<0.000000e+00> : vector<32x256xf32>
      %141 = tpu.matmul %140, %138, %cst_87 {dimension_numbers = #tpu.dot_dimension_numbers<[1], [0], [0], [1], [0, 0, 1, 1], [], []>} : vector<32x32xbf16>, vector<32x256xbf16>, vector<32x256xf32> -> vector<32x256xf32>
      %142 = arith.addf %133, %141 : vector<32x256xf32>
      %143 = vector.extract_strided_slice %117 {offsets = [0, 127], sizes = [32, 256], strides = [1, 1]} : vector<32x512xbf16> to vector<32x256xbf16>
      %cst_88 = arith.constant 0.000000e+00 : bf16
      %144 = vector.broadcast %cst_88 : bf16 to vector<32x256xbf16>
      %145 = vector.shape_cast %18 : vector<1x256xi1> to vector<1x256xi1>
      %146 = vector.broadcast %145 : vector<1x256xi1> to vector<32x256xi1>
      %147 = arith.select %146, %143, %144 : vector<32x256xi1>, vector<32x256xbf16>
      %c1_89 = arith.constant 1 : index
      %c3_90 = arith.constant 3 : index
      %c0_91 = arith.constant 0 : index
      %c0_92 = arith.constant 0 : index
      %148 = vector.load %arg2[%c1_89, %c3_90, %c0_91, %c0_92] : memref<3x9x32x32xbf16, #tpu.memory_space<vmem>>, vector<1x1x32x32xbf16>
      %149 = vector.shape_cast %148 : vector<1x1x32x32xbf16> to vector<32x32xbf16>
      %cst_93 = arith.constant dense<0.000000e+00> : vector<32x256xf32>
      %150 = tpu.matmul %149, %147, %cst_93 {dimension_numbers = #tpu.dot_dimension_numbers<[1], [0], [0], [1], [0, 0, 1, 1], [], []>} : vector<32x32xbf16>, vector<32x256xbf16>, vector<32x256xf32> -> vector<32x256xf32>
      %151 = arith.addf %142, %150 : vector<32x256xf32>
      %152 = vector.extract_strided_slice %117 {offsets = [0, 128], sizes = [32, 256], strides = [1, 1]} : vector<32x512xbf16> to vector<32x256xbf16>
      %c1_94 = arith.constant 1 : index
      %c4_95 = arith.constant 4 : index
      %c0_96 = arith.constant 0 : index
      %c0_97 = arith.constant 0 : index
      %153 = vector.load %arg2[%c1_94, %c4_95, %c0_96, %c0_97] : memref<3x9x32x32xbf16, #tpu.memory_space<vmem>>, vector<1x1x32x32xbf16>
      %154 = vector.shape_cast %153 : vector<1x1x32x32xbf16> to vector<32x32xbf16>
      %cst_98 = arith.constant dense<0.000000e+00> : vector<32x256xf32>
      %155 = tpu.matmul %154, %152, %cst_98 {dimension_numbers = #tpu.dot_dimension_numbers<[1], [0], [0], [1], [0, 0, 1, 1], [], []>} : vector<32x32xbf16>, vector<32x256xbf16>, vector<32x256xf32> -> vector<32x256xf32>
      %156 = arith.addf %151, %155 : vector<32x256xf32>
      %157 = vector.extract_strided_slice %117 {offsets = [0, 129], sizes = [32, 256], strides = [1, 1]} : vector<32x512xbf16> to vector<32x256xbf16>
      %cst_99 = arith.constant 0.000000e+00 : bf16
      %158 = vector.broadcast %cst_99 : bf16 to vector<32x256xbf16>
      %159 = vector.shape_cast %20 : vector<1x256xi1> to vector<1x256xi1>
      %160 = vector.broadcast %159 : vector<1x256xi1> to vector<32x256xi1>
      %161 = arith.select %160, %157, %158 : vector<32x256xi1>, vector<32x256xbf16>
      %c1_100 = arith.constant 1 : index
      %c5_101 = arith.constant 5 : index
      %c0_102 = arith.constant 0 : index
      %c0_103 = arith.constant 0 : index
      %162 = vector.load %arg2[%c1_100, %c5_101, %c0_102, %c0_103] : memref<3x9x32x32xbf16, #tpu.memory_space<vmem>>, vector<1x1x32x32xbf16>
      %163 = vector.shape_cast %162 : vector<1x1x32x32xbf16> to vector<32x32xbf16>
      %cst_104 = arith.constant dense<0.000000e+00> : vector<32x256xf32>
      %164 = tpu.matmul %163, %161, %cst_104 {dimension_numbers = #tpu.dot_dimension_numbers<[1], [0], [0], [1], [0, 0, 1, 1], [], []>} : vector<32x32xbf16>, vector<32x256xbf16>, vector<32x256xf32> -> vector<32x256xf32>
      %165 = arith.addf %156, %164 : vector<32x256xf32>
      %166 = vector.extract_strided_slice %117 {offsets = [0, 143], sizes = [32, 256], strides = [1, 1]} : vector<32x512xbf16> to vector<32x256xbf16>
      %cst_105 = arith.constant 0.000000e+00 : bf16
      %167 = vector.broadcast %cst_105 : bf16 to vector<32x256xbf16>
      %168 = vector.shape_cast %18 : vector<1x256xi1> to vector<1x256xi1>
      %169 = vector.broadcast %168 : vector<1x256xi1> to vector<32x256xi1>
      %170 = arith.select %169, %166, %167 : vector<32x256xi1>, vector<32x256xbf16>
      %c1_106 = arith.constant 1 : index
      %c6_107 = arith.constant 6 : index
      %c0_108 = arith.constant 0 : index
      %c0_109 = arith.constant 0 : index
      %171 = vector.load %arg2[%c1_106, %c6_107, %c0_108, %c0_109] : memref<3x9x32x32xbf16, #tpu.memory_space<vmem>>, vector<1x1x32x32xbf16>
      %172 = vector.shape_cast %171 : vector<1x1x32x32xbf16> to vector<32x32xbf16>
      %cst_110 = arith.constant dense<0.000000e+00> : vector<32x256xf32>
      %173 = tpu.matmul %172, %170, %cst_110 {dimension_numbers = #tpu.dot_dimension_numbers<[1], [0], [0], [1], [0, 0, 1, 1], [], []>} : vector<32x32xbf16>, vector<32x256xbf16>, vector<32x256xf32> -> vector<32x256xf32>
      %174 = arith.addf %165, %173 : vector<32x256xf32>
      %175 = vector.extract_strided_slice %117 {offsets = [0, 144], sizes = [32, 256], strides = [1, 1]} : vector<32x512xbf16> to vector<32x256xbf16>
      %c1_111 = arith.constant 1 : index
      %c7_112 = arith.constant 7 : index
      %c0_113 = arith.constant 0 : index
      %c0_114 = arith.constant 0 : index
      %176 = vector.load %arg2[%c1_111, %c7_112, %c0_113, %c0_114] : memref<3x9x32x32xbf16, #tpu.memory_space<vmem>>, vector<1x1x32x32xbf16>
      %177 = vector.shape_cast %176 : vector<1x1x32x32xbf16> to vector<32x32xbf16>
      %cst_115 = arith.constant dense<0.000000e+00> : vector<32x256xf32>
      %178 = tpu.matmul %177, %175, %cst_115 {dimension_numbers = #tpu.dot_dimension_numbers<[1], [0], [0], [1], [0, 0, 1, 1], [], []>} : vector<32x32xbf16>, vector<32x256xbf16>, vector<32x256xf32> -> vector<32x256xf32>
      %179 = arith.addf %174, %178 : vector<32x256xf32>
      %180 = vector.extract_strided_slice %117 {offsets = [0, 145], sizes = [32, 256], strides = [1, 1]} : vector<32x512xbf16> to vector<32x256xbf16>
      %cst_116 = arith.constant 0.000000e+00 : bf16
      %181 = vector.broadcast %cst_116 : bf16 to vector<32x256xbf16>
      %182 = vector.shape_cast %20 : vector<1x256xi1> to vector<1x256xi1>
      %183 = vector.broadcast %182 : vector<1x256xi1> to vector<32x256xi1>
      %184 = arith.select %183, %180, %181 : vector<32x256xi1>, vector<32x256xbf16>
      %c1_117 = arith.constant 1 : index
      %c8_118 = arith.constant 8 : index
      %c0_119 = arith.constant 0 : index
      %c0_120 = arith.constant 0 : index
      %185 = vector.load %arg2[%c1_117, %c8_118, %c0_119, %c0_120] : memref<3x9x32x32xbf16, #tpu.memory_space<vmem>>, vector<1x1x32x32xbf16>
      %186 = vector.shape_cast %185 : vector<1x1x32x32xbf16> to vector<32x32xbf16>
      %cst_121 = arith.constant dense<0.000000e+00> : vector<32x256xf32>
      %187 = tpu.matmul %186, %184, %cst_121 {dimension_numbers = #tpu.dot_dimension_numbers<[1], [0], [0], [1], [0, 0, 1, 1], [], []>} : vector<32x32xbf16>, vector<32x256xbf16>, vector<32x256xf32> -> vector<32x256xf32>
      %188 = arith.addf %179, %187 : vector<32x256xf32>
      %cst_122 = arith.constant 0.000000e+00 : f32
      %189 = vector.broadcast %cst_122 : f32 to vector<32x256xf32>
      %190 = arith.maximumf %188, %189 : vector<32x256xf32>
      %191 = arith.truncf %190 : vector<32x256xf32> to vector<32x256xbf16>
      %192 = tpu.concatenate %21, %191, %21 in 1 : vector<32x128xbf16>, vector<32x256xbf16>, vector<32x128xbf16> -> vector<32x512xbf16>
      %c2_123 = arith.constant 2 : index
      %c0_124 = arith.constant 0 : index
      %c0_125 = arith.constant 0 : index
      %193 = vector.load %arg3[%c2_123, %c0_124, %c0_125] : memref<3x32x256xf32, #tpu.memory_space<vmem>>, vector<1x32x256xf32>
      %194 = vector.shape_cast %193 : vector<1x32x256xf32> to vector<32x256xf32>
      %195 = vector.extract_strided_slice %192 {offsets = [0, 111], sizes = [32, 256], strides = [1, 1]} : vector<32x512xbf16> to vector<32x256xbf16>
      %cst_126 = arith.constant 0.000000e+00 : bf16
      %196 = vector.broadcast %cst_126 : bf16 to vector<32x256xbf16>
      %197 = vector.shape_cast %18 : vector<1x256xi1> to vector<1x256xi1>
      %198 = vector.broadcast %197 : vector<1x256xi1> to vector<32x256xi1>
      %199 = arith.select %198, %195, %196 : vector<32x256xi1>, vector<32x256xbf16>
      %c2_127 = arith.constant 2 : index
      %c0_128 = arith.constant 0 : index
      %c0_129 = arith.constant 0 : index
      %c0_130 = arith.constant 0 : index
      %200 = vector.load %arg2[%c2_127, %c0_128, %c0_129, %c0_130] : memref<3x9x32x32xbf16, #tpu.memory_space<vmem>>, vector<1x1x32x32xbf16>
      %201 = vector.shape_cast %200 : vector<1x1x32x32xbf16> to vector<32x32xbf16>
      %cst_131 = arith.constant dense<0.000000e+00> : vector<32x256xf32>
      %202 = tpu.matmul %201, %199, %cst_131 {dimension_numbers = #tpu.dot_dimension_numbers<[1], [0], [0], [1], [0, 0, 1, 1], [], []>} : vector<32x32xbf16>, vector<32x256xbf16>, vector<32x256xf32> -> vector<32x256xf32>
      %203 = arith.addf %194, %202 : vector<32x256xf32>
      %204 = vector.extract_strided_slice %192 {offsets = [0, 112], sizes = [32, 256], strides = [1, 1]} : vector<32x512xbf16> to vector<32x256xbf16>
      %c2_132 = arith.constant 2 : index
      %c1_133 = arith.constant 1 : index
      %c0_134 = arith.constant 0 : index
      %c0_135 = arith.constant 0 : index
      %205 = vector.load %arg2[%c2_132, %c1_133, %c0_134, %c0_135] : memref<3x9x32x32xbf16, #tpu.memory_space<vmem>>, vector<1x1x32x32xbf16>
      %206 = vector.shape_cast %205 : vector<1x1x32x32xbf16> to vector<32x32xbf16>
      %cst_136 = arith.constant dense<0.000000e+00> : vector<32x256xf32>
      %207 = tpu.matmul %206, %204, %cst_136 {dimension_numbers = #tpu.dot_dimension_numbers<[1], [0], [0], [1], [0, 0, 1, 1], [], []>} : vector<32x32xbf16>, vector<32x256xbf16>, vector<32x256xf32> -> vector<32x256xf32>
      %208 = arith.addf %203, %207 : vector<32x256xf32>
      %209 = vector.extract_strided_slice %192 {offsets = [0, 113], sizes = [32, 256], strides = [1, 1]} : vector<32x512xbf16> to vector<32x256xbf16>
      %cst_137 = arith.constant 0.000000e+00 : bf16
      %210 = vector.broadcast %cst_137 : bf16 to vector<32x256xbf16>
      %211 = vector.shape_cast %20 : vector<1x256xi1> to vector<1x256xi1>
      %212 = vector.broadcast %211 : vector<1x256xi1> to vector<32x256xi1>
      %213 = arith.select %212, %209, %210 : vector<32x256xi1>, vector<32x256xbf16>
      %c2_138 = arith.constant 2 : index
      %c2_139 = arith.constant 2 : index
      %c0_140 = arith.constant 0 : index
      %c0_141 = arith.constant 0 : index
      %214 = vector.load %arg2[%c2_138, %c2_139, %c0_140, %c0_141] : memref<3x9x32x32xbf16, #tpu.memory_space<vmem>>, vector<1x1x32x32xbf16>
      %215 = vector.shape_cast %214 : vector<1x1x32x32xbf16> to vector<32x32xbf16>
      %cst_142 = arith.constant dense<0.000000e+00> : vector<32x256xf32>
      %216 = tpu.matmul %215, %213, %cst_142 {dimension_numbers = #tpu.dot_dimension_numbers<[1], [0], [0], [1], [0, 0, 1, 1], [], []>} : vector<32x32xbf16>, vector<32x256xbf16>, vector<32x256xf32> -> vector<32x256xf32>
      %217 = arith.addf %208, %216 : vector<32x256xf32>
      %218 = vector.extract_strided_slice %192 {offsets = [0, 127], sizes = [32, 256], strides = [1, 1]} : vector<32x512xbf16> to vector<32x256xbf16>
      %cst_143 = arith.constant 0.000000e+00 : bf16
      %219 = vector.broadcast %cst_143 : bf16 to vector<32x256xbf16>
      %220 = vector.shape_cast %18 : vector<1x256xi1> to vector<1x256xi1>
      %221 = vector.broadcast %220 : vector<1x256xi1> to vector<32x256xi1>
      %222 = arith.select %221, %218, %219 : vector<32x256xi1>, vector<32x256xbf16>
      %c2_144 = arith.constant 2 : index
      %c3_145 = arith.constant 3 : index
      %c0_146 = arith.constant 0 : index
      %c0_147 = arith.constant 0 : index
      %223 = vector.load %arg2[%c2_144, %c3_145, %c0_146, %c0_147] : memref<3x9x32x32xbf16, #tpu.memory_space<vmem>>, vector<1x1x32x32xbf16>
      %224 = vector.shape_cast %223 : vector<1x1x32x32xbf16> to vector<32x32xbf16>
      %cst_148 = arith.constant dense<0.000000e+00> : vector<32x256xf32>
      %225 = tpu.matmul %224, %222, %cst_148 {dimension_numbers = #tpu.dot_dimension_numbers<[1], [0], [0], [1], [0, 0, 1, 1], [], []>} : vector<32x32xbf16>, vector<32x256xbf16>, vector<32x256xf32> -> vector<32x256xf32>
      %226 = arith.addf %217, %225 : vector<32x256xf32>
      %227 = vector.extract_strided_slice %192 {offsets = [0, 128], sizes = [32, 256], strides = [1, 1]} : vector<32x512xbf16> to vector<32x256xbf16>
      %c2_149 = arith.constant 2 : index
      %c4_150 = arith.constant 4 : index
      %c0_151 = arith.constant 0 : index
      %c0_152 = arith.constant 0 : index
      %228 = vector.load %arg2[%c2_149, %c4_150, %c0_151, %c0_152] : memref<3x9x32x32xbf16, #tpu.memory_space<vmem>>, vector<1x1x32x32xbf16>
      %229 = vector.shape_cast %228 : vector<1x1x32x32xbf16> to vector<32x32xbf16>
      %cst_153 = arith.constant dense<0.000000e+00> : vector<32x256xf32>
      %230 = tpu.matmul %229, %227, %cst_153 {dimension_numbers = #tpu.dot_dimension_numbers<[1], [0], [0], [1], [0, 0, 1, 1], [], []>} : vector<32x32xbf16>, vector<32x256xbf16>, vector<32x256xf32> -> vector<32x256xf32>
      %231 = arith.addf %226, %230 : vector<32x256xf32>
      %232 = vector.extract_strided_slice %192 {offsets = [0, 129], sizes = [32, 256], strides = [1, 1]} : vector<32x512xbf16> to vector<32x256xbf16>
      %cst_154 = arith.constant 0.000000e+00 : bf16
      %233 = vector.broadcast %cst_154 : bf16 to vector<32x256xbf16>
      %234 = vector.shape_cast %20 : vector<1x256xi1> to vector<1x256xi1>
      %235 = vector.broadcast %234 : vector<1x256xi1> to vector<32x256xi1>
      %236 = arith.select %235, %232, %233 : vector<32x256xi1>, vector<32x256xbf16>
      %c2_155 = arith.constant 2 : index
      %c5_156 = arith.constant 5 : index
      %c0_157 = arith.constant 0 : index
      %c0_158 = arith.constant 0 : index
      %237 = vector.load %arg2[%c2_155, %c5_156, %c0_157, %c0_158] : memref<3x9x32x32xbf16, #tpu.memory_space<vmem>>, vector<1x1x32x32xbf16>
      %238 = vector.shape_cast %237 : vector<1x1x32x32xbf16> to vector<32x32xbf16>
      %cst_159 = arith.constant dense<0.000000e+00> : vector<32x256xf32>
      %239 = tpu.matmul %238, %236, %cst_159 {dimension_numbers = #tpu.dot_dimension_numbers<[1], [0], [0], [1], [0, 0, 1, 1], [], []>} : vector<32x32xbf16>, vector<32x256xbf16>, vector<32x256xf32> -> vector<32x256xf32>
      %240 = arith.addf %231, %239 : vector<32x256xf32>
      %241 = vector.extract_strided_slice %192 {offsets = [0, 143], sizes = [32, 256], strides = [1, 1]} : vector<32x512xbf16> to vector<32x256xbf16>
      %cst_160 = arith.constant 0.000000e+00 : bf16
      %242 = vector.broadcast %cst_160 : bf16 to vector<32x256xbf16>
      %243 = vector.shape_cast %18 : vector<1x256xi1> to vector<1x256xi1>
      %244 = vector.broadcast %243 : vector<1x256xi1> to vector<32x256xi1>
      %245 = arith.select %244, %241, %242 : vector<32x256xi1>, vector<32x256xbf16>
      %c2_161 = arith.constant 2 : index
      %c6_162 = arith.constant 6 : index
      %c0_163 = arith.constant 0 : index
      %c0_164 = arith.constant 0 : index
      %246 = vector.load %arg2[%c2_161, %c6_162, %c0_163, %c0_164] : memref<3x9x32x32xbf16, #tpu.memory_space<vmem>>, vector<1x1x32x32xbf16>
      %247 = vector.shape_cast %246 : vector<1x1x32x32xbf16> to vector<32x32xbf16>
      %cst_165 = arith.constant dense<0.000000e+00> : vector<32x256xf32>
      %248 = tpu.matmul %247, %245, %cst_165 {dimension_numbers = #tpu.dot_dimension_numbers<[1], [0], [0], [1], [0, 0, 1, 1], [], []>} : vector<32x32xbf16>, vector<32x256xbf16>, vector<32x256xf32> -> vector<32x256xf32>
      %249 = arith.addf %240, %248 : vector<32x256xf32>
      %250 = vector.extract_strided_slice %192 {offsets = [0, 144], sizes = [32, 256], strides = [1, 1]} : vector<32x512xbf16> to vector<32x256xbf16>
      %c2_166 = arith.constant 2 : index
      %c7_167 = arith.constant 7 : index
      %c0_168 = arith.constant 0 : index
      %c0_169 = arith.constant 0 : index
      %251 = vector.load %arg2[%c2_166, %c7_167, %c0_168, %c0_169] : memref<3x9x32x32xbf16, #tpu.memory_space<vmem>>, vector<1x1x32x32xbf16>
      %252 = vector.shape_cast %251 : vector<1x1x32x32xbf16> to vector<32x32xbf16>
      %cst_170 = arith.constant dense<0.000000e+00> : vector<32x256xf32>
      %253 = tpu.matmul %252, %250, %cst_170 {dimension_numbers = #tpu.dot_dimension_numbers<[1], [0], [0], [1], [0, 0, 1, 1], [], []>} : vector<32x32xbf16>, vector<32x256xbf16>, vector<32x256xf32> -> vector<32x256xf32>
      %254 = arith.addf %249, %253 : vector<32x256xf32>
      %255 = vector.extract_strided_slice %192 {offsets = [0, 145], sizes = [32, 256], strides = [1, 1]} : vector<32x512xbf16> to vector<32x256xbf16>
      %cst_171 = arith.constant 0.000000e+00 : bf16
      %256 = vector.broadcast %cst_171 : bf16 to vector<32x256xbf16>
      %257 = vector.shape_cast %20 : vector<1x256xi1> to vector<1x256xi1>
      %258 = vector.broadcast %257 : vector<1x256xi1> to vector<32x256xi1>
      %259 = arith.select %258, %255, %256 : vector<32x256xi1>, vector<32x256xbf16>
      %c2_172 = arith.constant 2 : index
      %c8_173 = arith.constant 8 : index
      %c0_174 = arith.constant 0 : index
      %c0_175 = arith.constant 0 : index
      %260 = vector.load %arg2[%c2_172, %c8_173, %c0_174, %c0_175] : memref<3x9x32x32xbf16, #tpu.memory_space<vmem>>, vector<1x1x32x32xbf16>
      %261 = vector.shape_cast %260 : vector<1x1x32x32xbf16> to vector<32x32xbf16>
      %cst_176 = arith.constant dense<0.000000e+00> : vector<32x256xf32>
      %262 = tpu.matmul %261, %259, %cst_176 {dimension_numbers = #tpu.dot_dimension_numbers<[1], [0], [0], [1], [0, 0, 1, 1], [], []>} : vector<32x32xbf16>, vector<32x256xbf16>, vector<32x256xf32> -> vector<32x256xf32>
      %263 = arith.addf %254, %262 : vector<32x256xf32>
      %264 = vector.extract_strided_slice %263 {offsets = [0, 0], sizes = [12, 256], strides = [1, 1]} : vector<32x256xf32> to vector<12x256xf32>
      %265 = tpu.concatenate %33, %33, %33, %33 in 0 : vector<3x256xf32>, vector<3x256xf32>, vector<3x256xf32>, vector<3x256xf32> -> vector<12x256xf32>
      %266 = arith.addf %264, %265 : vector<12x256xf32>
      %267 = vector.extract_strided_slice %263 {offsets = [12, 0], sizes = [8, 256], strides = [1, 1]} : vector<32x256xf32> to vector<8x256xf32>
      %cst_177 = arith.constant 0.000000e+00 : f32
      %268 = vector.broadcast %cst_177 : f32 to vector<8x256xf32>
      %269 = arith.maximumf %267, %268 : vector<8x256xf32>
      %c0_178 = arith.constant 0 : index
      %270 = arith.index_cast %arg5 : i32 to index
      %c0_179 = arith.constant 0 : index
      %c0_180 = arith.constant 0 : index
      %271 = vector.load %arg4[%c0_178, %270, %c0_179, %c0_180] : memref<1x3x12x256xf32, #tpu.memory_space<vmem>>, vector<1x1x12x256xf32>
      %272 = vector.shape_cast %271 : vector<1x1x12x256xf32> to vector<12x256xf32>
      %273 = vector.shape_cast %266 : vector<12x256xf32> to vector<1x1x12x256xf32>
      tpu.vector_store %arg4[%c0_178, %270, %c0_179, %c0_180], %273 {strides = array<i32>} : memref<1x3x12x256xf32, #tpu.memory_space<vmem>>, vector<1x1x12x256xf32>,
      scf.yield %266, %269 : vector<12x256xf32>, vector<8x256xf32>
    }
    %c3_i32_9 = arith.constant 3 : i32
    return
  }
  func.func @transform_0(%arg0: i32) -> (i32, i32, i32, i32) {
    %c0_i32 = arith.constant 0 : i32
    %c0_i32_0 = arith.constant 0 : i32
    %c0_i32_1 = arith.constant 0 : i32
    %c0_i32_2 = arith.constant 0 : i32
    return %arg0, %c0_i32, %c0_i32_0, %c0_i32_1 : i32, i32, i32, i32
  }
  func.func @transform_1(%arg0: i32) -> (i32, i32, i32, i32) {
    %c0_i32 = arith.constant 0 : i32
    %c0_i32_0 = arith.constant 0 : i32
    %c0_i32_1 = arith.constant 0 : i32
    %c0_i32_2 = arith.constant 0 : i32
    %c0_i32_3 = arith.constant 0 : i32
    return %c0_i32, %c0_i32_0, %c0_i32_1, %c0_i32_2 : i32, i32, i32, i32
  }
  func.func @transform_2(%arg0: i32) -> (i32, i32, i32) {
    %c0_i32 = arith.constant 0 : i32
    %c0_i32_0 = arith.constant 0 : i32
    %c0_i32_1 = arith.constant 0 : i32
    %c0_i32_2 = arith.constant 0 : i32
    return %c0_i32, %c0_i32_0, %c0_i32_1 : i32, i32, i32
  }
  func.func @transform_3(%arg0: i32) -> (i32, i32, i32, i32) {
    %c0_i32 = arith.constant 0 : i32
    %c0_i32_0 = arith.constant 0 : i32
    %c0_i32_1 = arith.constant 0 : i32
    %c0_i32_2 = arith.constant 0 : i32
    return %arg0, %c0_i32, %c0_i32_0, %c0_i32_1 : i32, i32, i32, i32
  }
}

</mosaic_0001>

<bundles_post_ra>
// kernel: rlsp_forward.1
= control target key start
LH: loop header
LB: loop body
LE: loop exit
PB: predicated region body
PF: predicated region fallthrough
CT: control target
= control target key end

     0   :  { %8 = vsyncpa [#allocation3], 0  ;;  %s3770_s12 = smov 0   ;;  %s5092_s0 = inlined_call_operand.vmem [shape: f32[2,3,3,256], index: 0, kind: input, shape index: {}]   ;;  %s5093_s1 = inlined_call_operand.hbm [shape: bf16[3,9,32,32], index: 1, kind: input, shape index: {}]   ;;  %s5094_s2 = inlined_call_operand.vmem [shape: f32[3,32,256], index: 2, kind: input, shape index: {}]   ;;  %s5095_s3 = inlined_call_operand.vmem [shape: f32[2,3,12,256], index: 3, kind: output, shape index: {}]  }
   0x1 LB: > { %s3308_s13 = sadd.s32 4294967295, %s3699_s12   ;;  %p3310_p0 = scmp.ge.s32.totalorder %s3699_s12, 1  ;;  %s3699_s12 = sphi %s3770_s12, %s14_s12  }
   0x2   : > { %p113_p1 = scmp.lt.s32.totalorder %s3699_s12, 3  ;;  %s3737_s14 = smov [#allocation2]  }
   0x3   : > { %s125_s15 = sshll.u32 %s3737_s14, 4  ;;  %p3474_p3 = scmp.eq.s32.totalorder %s3308_s13, 0  ;;  %s126_s15 = int_to_ptr.vmem [resolvable:$true] %s125_s15 }
   0x4   : > { %p3778_p2 = pnand %p3310_p0, %p113_p1  ;;  %s3638_s17 = scalar_lea.vmem %s126_s15, 6912 }
   0x5   : > { %p3639_p7 = scmp.ne.s32.totalorder %s126_s15, %s3638_s17  ;;  %p3646_p10 = scmp.lt.s32.totalorder %s126_s15, %s126_s15 }
   0x6   : > { %p3470_p4 = pneg %p3778_p2  ;;  %p3647_p11 = scmp.lt.s32.totalorder %s3638_s17, %s3638_s17 }
   0x8   : > { %p3471_p5 = pnand %p3474_p3, %p3470_p4  ;;  %p3648_p12 = por %p3647_p11, %p3646_p10 }
   0xa   : > { %p3629_p6 = pneg %p3471_p5 }
   0xc   : > { %p3641_p8 = pnand %p3639_p7, %p3629_p6 }
   0xe   : > { %p3642_p9 = pneg %p3641_p8 }
  0x10   : > { %p3649_p13 = pnand %p3648_p12, %p3642_p9 }
  0x12   : > { %3652 = shalt.err (!%p3649_p13)
}
  0x13   : > { %s3738_s18 = smov 64   ;;  %s3739_s19 = smov 4  }
  0x14   : > { %3473 = dma.hbm_to_vmem [thread:$0]  (!%p3471_p5), %s5093_s1, 6912, %s126_s15, [#allocation3], %s3738_s18, %s3738_s18, %s3739_s19  }
  0x15   : > { %152 = sbr.rel (%p3778_p2) target bundleno = 1367 (0x557), region = 32 }
  0x1a   : > { %3694 = dma.done.wait (%p3474_p3), [#allocation3], 6912  }
  0x1b   : > { %3696 = vsyncadd (%p3474_p3), [#allocation3], 4294960384  ;;  %p176_p0 = scmp.lt.s32.totalorder %s3308_s13, 1  ;;  %v5110_v0 = vlaneseq  ;;  %v5187_v5 = vmov 0  ;;  %v5190_v6 = vmov 0  ;;  %v5193_v7 = vmov 0 }
  0x1c   : > { %v5196_v8 = vmov 0  ;;  %v3819_v9 = vmov 0.0   ;;  %v3821_v10 = vmov 0.0   ;;  %v3823_v11 = vmov 0.0   ;;  %s3835_s30 = smov 0  }
  0x1d   : > { %s5376_s13 = smov (!%p176_p0, %s3308_s13), 1  ;;  %v190_v1 = vand.u32 127, %v5110_v0  ;;  %v3825_v12 = vmov 0.0   ;;  %v3827_v13 = vmov 0.0   ;;  %v3829_v14 = vmov 0.0  }
  0x1e   : > { %s3464_s22 = smul.u32 24, %s5376_s13  ;;  %v3831_v15 = vmov 0.0   ;;  %v3833_v16 = vmov 0.0  }
  0x1f   : > { %v191_v2 = vadd.s32 128, %v190_v1  ;;  %v196_v3 = vand.u32 15, %v190_v1  ;;  %s3465_s23 = smul.u32 96, %s5376_s13 }
  0x20   : > { %s3796_s26 = scalar_lea.vmem %s5092_s0, %s3464_s22 }
  0x21   : > { %v203_v4 = vand.u32 15, %v191_v2  ;;  %vm3798_vm0 = vcmp.ge.s32.totalorder %v196_v3, 1  ;;  %vm3802_vm1 = vcmp.le.s32.totalorder %v196_v3, 14  ;;  %s3809_s29 = scalar_lea.vmem %s5095_s3, %s3465_s23 }
  0x22   : > { %v5188_v5 = vsel %vm3798_vm0, 4294967295, %v5187_v5  ;;  %v5191_v6 = vsel %vm3802_vm1, 4294967295, %v5190_v6 }
  0x23   : > { %5189 = vst [vmem:[#allocation5_spill] sm:$0xff] %v5188_v5  ;;  %5192 = vst [vmem:[#allocation6_spill] sm:$0xff] %v5191_v6  ;;  %vm3811_vm2 = vcmp.ge.s32.totalorder %v203_v4, 1  ;;  %vm3815_vm3 = vcmp.le.s32.totalorder %v203_v4, 14 }
  0x24   : > { %v5194_v7 = vsel %vm3811_vm2, 4294967295, %v5193_v7  ;;  %v5197_v8 = vsel %vm3815_vm3, 4294967295, %v5196_v8 }
  0x25   : > { %5195 = vst [vmem:[#allocation7_spill] sm:$0xff] %v5194_v7  ;;  %5198 = vst [vmem:[#allocation8_spill] sm:$0xff] %v5197_v8 }
  0x26 LB: >> { %vm325_vm4 = vmpackc.low %vm3811_vm2, %vm3798_vm0  ;;  %v5201_v0 = vlaneseq  ;;  %v5113_v18 = vmov 0   ;;  %s3741_s4 = smov 111   ;;  %s3742_s5 = smov 113   ;;  %v286_v27 = vrot.slane %v3715_v12, 7  ;;  %v288_v28 = vrot.slane %v3707_v10, 7  ;;  %s3735_s30 = sphi %s3835_s30, %s5374_s30   ;;  %v3731_v16 = vphi %v3833_v16, %v3189_v16   ;;  %v3727_v15 = vphi %v3831_v15, %v3190_v15   ;;  %v3723_v14 = vphi %v3829_v14, %v3191_v14   ;;  %v3719_v13 = vphi %v3827_v13, %v3192_v13   ;;  %v3715_v12 = vphi %v3825_v12, %v3193_v12   ;;  %v3711_v11 = vphi %v3823_v11, %v3194_v11   ;;  %v3707_v10 = vphi %v3821_v10, %v3195_v10   ;;  %v3703_v9 = vphi %v3819_v9, %v3196_v9  }
  0x27   : >> { %v326_v19 = vsel %vm325_vm4, 65537, %v5113_v18  ;;  %vm562_vm5 = vmpackc.low %vm3815_vm3, %vm3802_vm1  ;;  %424 = vmatprep.mubr.bf16.mxu0 %v5113_v18  ;;  %434 = vmatprep.mubr.bf16.mxu1 %v5113_v18  ;;  %vm5096_vm6 = vcmask 1040384   ;;  %vm304_vm7 = vcmask 1044480   ;;  %v272_v30 = vrot.slane %v3731_v16, 7  ;;  %s3743_s6 = smov 127   ;;  %s3744_s7 = smov 1  }
  0x28   : >> { %v328_v17 = vshrl.u32 %v5201_v0, 7  ;;  %v563_v21 = vsel %vm562_vm5, 65537, %v5113_v18  ;;  %v3870_v29 = vsel %vm5096_vm6, %v286_v27, %v288_v28  ;;  %v274_v31 = vrot.slane %v3723_v14, 7  ;;  %s3745_s8 = smov 15   ;;  %s3746_s9 = smov 17  }
  0x29   : >> { %v307_v32 = vsel %vm304_vm7, %v3870_v29, 0.0  ;;  %v273_v33 = vrot.slane %v3727_v15, 7  ;;  %v276_v34 = vrot.slane %v3719_v13, 7  ;;  %v287_v35 = vrot.slane %v3711_v11, 7  ;;  %s3747_s10 = smov 16   ;;  %s3914_s11 = sadd.s32 1, %s3735_s30  }
  0x2a   : >> { %v329_v20 = vsub.s32 0, %v328_v17  ;;  %v333_v22 = vsub.s32 4, %v328_v17  ;;  %v290_v36 = vrot.slane %v3703_v9, 7  ;;  %v275_v37 = vsel %vm5096_vm6, %v272_v30, %v274_v31  ;;  %s3317_s13 = sadd.s32 4294967295, %s3735_s30  ;;  %p238_p1 = scmp.lt.s32.totalorder %s3914_s11, 2 }
  0x2b   : >> { %v3886_v38 = vsel %vm304_vm7, %v275_v37, %v286_v27  ;;  %v277_v39 = vsel %vm5096_vm6, %v273_v33, %v276_v34  ;;  %p235_p2 = scmp.gt.s32.totalorder %s3317_s13, 0  ;;  %s3456_s14 = sshll.u32 %s3735_s30, 3  ;;  %vm5098_vm8 = vcmask 1042432   ;;  %vm5097_vm9 = vcmask 1045504  }
  0x2c   : >> { %v330_v23 = vrot.slane %v326_v19, %v329_v20  ;;  %v567_v24 = vrot.slane %v563_v21, %v329_v20  ;;  %v334_v25 = vrot.slane %v326_v19, %v333_v22  ;;  %v571_v26 = vrot.slane %v563_v21, %v333_v22  ;;  %s239_s15 = scalar_select %p238_p1, %s3914_s11, 2 }
  0x2d   : >> { %v3890_v40 = vsel %vm5096_vm6, %v287_v35, %v290_v36  ;;  %v3895_v41 = vpack.c.bf16 %v307_v32, %v3886_v38  ;;  %v3898_v42 = vsel %vm304_vm7, %v277_v39, %v287_v35  ;;  %s5378_s13 = smov (!%p235_p2, %s3317_s13), 0  ;;  %s3921_s16 = scalar_lea.vmem %s3796_s26, %s3456_s14  ;;  %vm5164_vm10 = vcmask 908288  }
  0x2e   : >> { %335 = vrot.lane.b32.xlu0 %v330_v23, %s3741_s4  ;;  %572 = vrot.lane.b32.xlu1 %v567_v24, %s3742_s5  ;;  %v308_v43 = vsel %vm304_vm7, %v3890_v40, 0.0  ;;  %s3458_s17 = sshll.u32 %s239_s15, 3  ;;  %s3457_s18 = sshll.u32 %s5378_s13, 3  ;;  %v3924_v45 = vld [vmem:[%s3921_s16] sm:$0x77]  ;;  %vm576_vm14 = vcmask 924672  }
  0x2f   : >> { %v3907_v44 = vpack.c.bf16 %v308_v43, %v3898_v42  ;;  %5204 = vst [vmem:[#allocation9_spill] sm:$0xff] %v3924_v45  ;;  %s250_s19 = scalar_lea.vmem %s3796_s26, %s3458_s17  ;;  %s246_s20 = scalar_lea.vmem %s3796_s26, %s3457_s18  ;;  %v3930_v47 = vcombine.high %v3924_v45, %v3924_v45  ;;  %v5112_v58 = vrot.slane %v3924_v45, 5  ;;  %vm693_vm5 = vcmask 1039360  }
  0x30   : >> { %v251_v46 = vld [vmem:[%s250_s19] sm:$0x77]  ;;  %s3748_s21 = smov 112   ;;  %p222_p3 = scmp.ge.s32.totalorder %s3914_s11, 3  }
  0x31   : >> { %5205 = vst [vmem:[#allocation10_spill] sm:$0xff] %v3930_v47  ;;  %v247_v48 = vld [vmem:[%s246_s20] sm:$0x77]  ;;  %v262_v49 = vcombine.high %v251_v46, %v251_v46  ;;  %v5111_v51 = vrot.slane %v3930_v47, 5  ;;  %v263_v60 = vrot.slane %v251_v46, 2 }
  0x32   : >> { %337 = vrot.lane.b32.xlu0 %v334_v25, %s3741_s4  ;;  %574 = vrot.lane.b32.xlu1 %v571_v26, %s3742_s5  ;;  %v253_v50 = vcombine.high %v247_v48, %v247_v48  ;;  %v297_v63 = vsel %vm5098_vm8, %v247_v48, %v5112_v58 }
  0x33   : >> { %v264_v52 = vrot.slane %v262_v49, 2  ;;  %v300_v4 = vsel %vm5097_vm9, %v297_v63, %v263_v60  ;;  %v302_v9 = vsel %vm5096_vm6, %v263_v60, %v272_v30 }
  0x34   : >> { %v298_v53 = vsel %vm5098_vm8, %v253_v50, %v5111_v51  ;;  %v3973_v12 = vpack.c.bf16 %v302_v9, %v300_v4 }
  0x35   : >> { %v301_v54 = vsel %vm5097_vm9, %v298_v53, %v264_v52  ;;  %v303_v55 = vsel %vm5096_vm6, %v264_v52, %v273_v33 }
  0x36   : >> { %691 = vrot.lane.b32.xlu1 %v334_v25, %s3743_s6  ;;  %689 = vrot.lane.b32.xlu0 %v330_v23, %s3743_s6  ;;  %v3939_v59 = vpack.c.bf16 %v303_v55, %v301_v54 }
  0x3a   : >> { %888 = vrot.lane.b32.xlu0 %v567_v24, %s3744_s7  ;;  %890 = vrot.lane.b32.xlu1 %v571_v26, %s3744_s7 }
  0x3e   : >> { %1003 = vrot.lane.b32.xlu0 %v330_v23, %s3745_s8  ;;  %1005 = vrot.lane.b32.xlu1 %v334_v25, %s3745_s8 }
  0x42   : >> { %1219 = vrot.lane.b32.xlu0 %v567_v24, %s3746_s9  ;;  %1221 = vrot.lane.b32.xlu1 %v571_v26, %s3746_s9 }
  0x46   : >> { %366 = vrot.lane.b32.xlu0 %v5113_v18, %s3746_s9  ;;  %478 = vrot.lane.b32.xlu1 %v3895_v41, %s3747_s10 }
  0x4a   : >> { %472 = vrot.lane.b32.xlu1 %v5113_v18, %s3747_s10  ;;  %480 = vrot.lane.b32.xlu0 %v3907_v44, %s3747_s10 }
  0xa0   : >> { %v336_v56 = vpop.permute.xlu0 %335  ;;  %v573_v57 = vpop.permute.xlu1 %572 }
  0xa4   : >> { %v3941_v61 = vpop.permute.xlu0 %337  ;;  %v3943_v62 = vpop.permute.xlu1 %574 }
  0xa5   : >> { %5206 = vst [vmem:[#allocation11_spill] sm:$0xff] %v3941_v61  ;;  %5207 = vst [vmem:[#allocation12_spill] sm:$0xff] %v3943_v62  ;;  %v3950_v1 = vsel %vm5164_vm10, %v336_v56, %v3941_v61  ;;  %vm5162_vm11 = vcmp.ne.s16.totalorder %v3941_v61, 0  ;;  %vm5100_vm12 = vcmp.ne.s16.totalorder %v3943_v62, 0  ;;  %v3985_v14 = vsel %vm576_vm14, %v573_v57, %v3943_v62 }
  0xa6   : >> { %5208 = vst [vmem:[#allocation13_spill] sm:$0xff] %v3950_v1  ;;  %v344_v2 = vsel %vm5162_vm11, %v3939_v59, 0  ;;  %v346_v3 = vsel %vm5162_vm11, %v3907_v44, 0  ;;  %vm5163_vm13 = vcmp.ne.s16.totalorder %v3950_v1, 0  ;;  %v583_v10 = vsel %vm5100_vm12, %v3907_v44, 0  ;;  %5209 = vst [vmem:[#allocation14_spill] sm:$0xff] %v3985_v14 }
  0xa7   : >> { %370 = vrot.lane.b32.xlu0 %v344_v2, %s3746_s9  ;;  %374 = vrot.lane.b32.xlu1 %v346_v3, %s3746_s9  ;;  %v345_v11 = vsel %vm5163_vm13, %v3895_v41, 0  ;;  %v343_v13 = vsel %vm5163_vm13, %v3973_v12, 0  ;;  %vm5102_vm15 = vcmp.ne.s16.totalorder %v3985_v14, 0  ;;  %v581_v20 = vsel %vm5100_vm12, %v3939_v59, 0  ;;  %v314_v14 = vld [vmem:[%s5094_s2 + $0x8] sm:$0xff]  ;;  %v320_v1 = vld [vmem:[%s5094_s2 + $0x38] sm:$0xff] }
  0xa8   : >> { %v582_v15 = vsel %vm5102_vm15, %v3895_v41, 0  ;;  %v580_v16 = vsel %vm5102_vm15, %v3973_v12, 0  ;;  %v3998_v17 = vpop.permute.xlu1 %691  ;;  %v690_v19 = vpop.permute.xlu0 %689  ;;  %vm613_vm12 = vcmask 121856  }
  0xa9   : >> { %5210 = vst [vmem:[#allocation15_spill] sm:$0xff] %v3998_v17  ;;  %vm5099_vm4 = vcmp.ne.s16.totalorder %v3998_v17, 0  ;;  %v4011_v21 = vsel %vm693_vm5, %v690_v19, %v3998_v17  ;;  %v3573_v19 = vld [vmem:[#allocation2 + $0x8] sm:$0xff]  }
  0xaa   : >> { %5211 = vst [vmem:[#allocation16_spill] sm:$0xff] %v4011_v21  ;;  %v700_v22 = vsel %vm5099_vm4, %v3907_v44, 0  ;;  %v698_v23 = vsel %vm5099_vm4, %v3939_v59, 0  ;;  %vm5101_vm6 = vcmp.ne.s16.totalorder %v4011_v21, 0  ;;  %vm730_vm4 = vcmask 7168   ;;  %v318_v17 = vld [vmem:[%s5094_s2 + $0x28] sm:$0xff] }
  0xab   : >> { %372 = vrot.lane.b32.xlu0 %v345_v11, %s3746_s9  ;;  %611 = vrot.lane.b32.xlu1 %v583_v10, %s3745_s8  ;;  %v699_v25 = vsel %vm5101_vm6, %v3895_v41, 0  ;;  %v697_v28 = vsel %vm5101_vm6, %v3973_v12, 0  ;;  %v319_v21 = vld [vmem:[%s5094_s2 + $0x30] sm:$0xff] }
  0xac   : >> { %v4019_v24 = vpop.permute.xlu0 %888  ;;  %v891_v27 = vpop.permute.xlu1 %890 }
  0xad   : >> { %5212 = vst [vmem:[#allocation17_spill] sm:$0xff] %v4019_v24  ;;  %vm5103_vm8 = vcmp.ne.s16.totalorder %v4019_v24, 0  ;;  %v4050_v33 = vsel %vm730_vm4, %v4019_v24, %v891_v27 }
  0xae   : >> { %v897_v32 = vsel %vm5103_vm8, %v3895_v41, 0  ;;  %5214 = vst [vmem:[#allocation19_spill] sm:$0xff] %v4050_v33  ;;  %v895_v35 = vsel %vm5103_vm8, %v3973_v12, 0  ;;  %vm5104_vm6 = vcmp.ne.s16.totalorder %v4050_v33, 0 }
  0xaf   : >> { %603 = vrot.lane.b32.xlu0 %v5113_v18, %s3745_s8  ;;  %368 = vrot.lane.b32.xlu1 %v343_v13, %s3746_s9  ;;  %v898_v37 = vsel %vm5104_vm6, %v3907_v44, 0  ;;  %v896_v39 = vsel %vm5104_vm6, %v3939_v59, 0  ;;  %vm5108_vm6 = vcmask 138240  }
  0xb0   : >> { %v4027_v26 = vpop.permute.xlu0 %1003  ;;  %v1006_v31 = vpop.permute.xlu1 %1005 }
  0xb1   : >> { %5213 = vst [vmem:[#allocation18_spill] sm:$0xff] %v4027_v26  ;;  %vm5109_vm9 = vcmp.ne.s16.totalorder %v4027_v26, 0  ;;  %v4054_v34 = vsel %vm613_vm12, %v4027_v26, %v1006_v31  ;;  %v316_v26 = vld [vmem:[%s5094_s2 + $0x18] sm:$0xff] }
  0xb2   : >> { %v1012_v30 = vsel %vm5109_vm9, %v3895_v41, 0  ;;  %5215 = vst [vmem:[#allocation20_spill] sm:$0xff] %v4054_v34  ;;  %vm5105_vm15 = vcmp.ne.s16.totalorder %v4054_v34, 0  ;;  %v1010_v43 = vsel %vm5109_vm9, %v3973_v12, 0  ;;  %v313_v34 = vld [vmem:[%s5094_s2] sm:$0xff] }
  0xb3   : >> { %476 = vrot.lane.b32.xlu0 %v3939_v59, %s3747_s10  ;;  %474 = vrot.lane.b32.xlu1 %v3973_v12, %s3747_s10  ;;  %v1013_v36 = vsel %vm5105_vm15, %v3907_v44, 0  ;;  %v1011_v46 = vsel %vm5105_vm15, %v3939_v59, 0 }
  0xb4   : >> { %v4083_v48 = vpop.permute.xlu0 %1219  ;;  %v1222_v49 = vpop.permute.xlu1 %1221 }
  0xb5   : >> { %5216 = vst [vmem:[#allocation21_spill] sm:$0xff] %v4083_v48  ;;  %vm5107_vm8 = vcmp.ne.s16.totalorder %v4083_v48, 0  ;;  %v4095_v50 = vsel %vm5108_vm6, %v4083_v48, %v1222_v49  ;;  %v315_v48 = vld [vmem:[%s5094_s2 + $0x10] sm:$0xff] }
  0xb6   : >> { %5217 = vst [vmem:[#allocation22_spill] sm:$0xff] %v4095_v50  ;;  %v1228_v52 = vsel %vm5107_vm8, %v3895_v41, 0  ;;  %vm5106_vm15 = vcmp.ne.s16.totalorder %v4095_v50, 0  ;;  %v1226_v54 = vsel %vm5107_vm8, %v3973_v12, 0  ;;  %vm385_vm8 = vcmask 261120   ;;  %v317_v50 = vld [vmem:[%s5094_s2 + $0x20] sm:$0xff] }
  0xb7   : >> { %609 = vrot.lane.b32.xlu0 %v582_v15, %s3745_s8  ;;  %605 = vrot.lane.b32.xlu1 %v580_v16, %s3745_s8  ;;  %v1229_v53 = vsel %vm5106_vm15, %v3907_v44, 0  ;;  %v3572_v16 = vld [vmem:[#allocation2] sm:$0xff]  }
  0xb8   : >> { %v4118_v55 = vpop.permute.xlu0 %366 }
  0xb9   : >> { %5218 = vst [vmem:[#allocation23_spill] sm:$0xff] %v4118_v55 }
  0xbb   : >> { %607 = vrot.lane.b32.xlu0 %v581_v20, %s3745_s8  ;;  %720 = vrot.lane.b32.xlu1 %v5113_v18, %s3744_s7 }
  0xbc   : >> { %v481_v57 = vpop.permute.xlu0 %480 }
  0xbf   : >> { %728 = vrot.lane.b32.xlu0 %v700_v22, %s3744_s7  ;;  %724 = vrot.lane.b32.xlu1 %v698_v23, %s3744_s7 }
  0xc3   : >> { %922 = vrot.lane.b32.xlu0 %v5113_v18, %s3743_s6  ;;  %726 = vrot.lane.b32.xlu1 %v699_v25, %s3744_s7 }
  0xc7   : >> { %722 = vrot.lane.b32.xlu0 %v697_v28, %s3744_s7  ;;  %1037 = vrot.lane.b32.xlu1 %v5113_v18, %s3742_s5 }
  0xcb   : >> { %924 = vrot.lane.b32.xlu0 %v897_v32, %s3743_s6  ;;  %1039 = vrot.lane.b32.xlu1 %v1012_v30, %s3742_s5 }
  0xcf   : >> { %1137 = vrot.lane.b32.xlu0 %v5113_v18, %s3748_s21  ;;  %918 = vrot.lane.b32.xlu1 %v895_v35, %s3743_s6 }
  0xd3   : >> { %1041 = vrot.lane.b32.xlu0 %v1013_v36, %s3742_s5  ;;  %926 = vrot.lane.b32.xlu1 %v898_v37, %s3743_s6  ;;  %v3574_v36 = vld [vmem:[#allocation2 + $0x10] sm:$0xff]  }
  0xd7   : >> { %920 = vrot.lane.b32.xlu0 %v896_v39, %s3743_s6  ;;  %1033 = vrot.lane.b32.xlu1 %v1010_v43, %s3742_s5  ;;  %v3343_v43 = vpack.c.bf16 %v3890_v40, %v3898_v42  ;;  %v3576_v42 = vld [vmem:[#allocation2 + $0x18] sm:$0xff]  }
  0xdb   : >> { %1035 = vrot.lane.b32.xlu0 %v1011_v46, %s3742_s5  ;;  %1141 = vrot.lane.b32.xlu1 %v3907_v44, %s3748_s21  ;;  %v479_v44 = vpop.permute.xlu1 %478 }
  0xdf   : >> { %1139 = vrot.lane.b32.xlu0 %v3895_v41, %s3748_s21  ;;  %1253 = vrot.lane.b32.xlu1 %v5113_v18, %s3741_s4  ;;  %v1227_v41 = vsel %vm5106_vm15, %v3939_v59, 0  ;;  %v4120_v56 = vpop.permute.xlu1 %472  ;;  %vm482_vm15 = vcmask 130048  }
  0xe0   : >> { %5219 = vst [vmem:[#allocation24_spill] sm:$0xff] %v4120_v56  ;;  %v486_v20 = vsel %vm482_vm15, %v479_v44, %v481_v57  ;;  %v485_v25 = vsel %vm482_vm15, %v4120_v56, %v479_v44 }
  0xe3   : >> { %1135 = vrot.lane.b32.xlu0 %v3939_v59, %s3748_s21  ;;  %1255 = vrot.lane.b32.xlu1 %v1228_v52, %s3741_s4  ;;  %v3575_v52 = vld [vmem:[#allocation2 + $0x20] sm:$0xff]  }
  0xe7   : >> { %1257 = vrot.lane.b32.xlu0 %v1229_v53, %s3741_s4  ;;  %1133 = vrot.lane.b32.xlu1 %v3973_v12, %s3748_s21  ;;  %v3346_v53 = vpack.c.bf16 %v3870_v29, %v3886_v38  ;;  %v3577_v29 = vld [vmem:[#allocation2 + $0x28] sm:$0xff]  }
  0xeb   : >> { %1251 = vrot.lane.b32.xlu0 %v1227_v41, %s3741_s4  ;;  %1249 = vrot.lane.b32.xlu1 %v1226_v54, %s3741_s4 }
 0x119   : >> { %v371_v60 = vpop.permute.xlu0 %370  ;;  %v375_v63 = vpop.permute.xlu1 %374 }
 0x11d   : >> { %v373_v2 = vpop.permute.xlu0 %372  ;;  %v612_v3 = vpop.permute.xlu1 %611 }
 0x11e   : >> { %v380_v4 = vsel %vm5108_vm6, %v373_v2, %v375_v63  ;;  %v379_v9 = vsel %vm5108_vm6, %v4118_v55, %v373_v2 }
 0x11f   : >> { %404 = vmatprep.subr.bf16.mxu0 %v380_v4  ;;  %3460 = vmatprep.subr.bf16.mxu1 %v380_v4 }
 0x120   : >> { %405 = vmatpush1.bf16.msra.mxu0 %v379_v9  ;;  %3462 = vmatpush1.bf16.msra.mxu1 %v379_v9 }
 0x121   : >> { %v4125_v10 = vpop.permute.xlu0 %603  ;;  %v369_v11 = vpop.permute.xlu1 %368 }
 0x122   : >> { %5220 = vst [vmem:[#allocation25_spill] sm:$0xff] %v4125_v10  ;;  %v378_v13 = vsel %vm5108_vm6, %v369_v11, %v371_v60  ;;  %v377_v15 = vsel %vm5108_vm6, %v4118_v55, %v369_v11  ;;  %vm3749_vm6 = vmmov 1   ;;  %v3579_v11 = vld [vmem:[#allocation2 + $0x40] sm:$0xff]  }
 0x123   : >> { %406 = vmatprep.subr.bf16.mxu0 %v378_v13  ;;  %3461 = vmatprep.subr.bf16.mxu1 %v378_v13  ;;  %vm3342_vm9 = vmpackc.low %vm304_vm7, %vm3749_vm6  ;;  %vm1143_vm6 = vcmask 916480  }
 0x124   : >> { %407 = vmatpush1.bf16.msra.mxu0 %v377_v15  ;;  %3463 = vmatpush1.bf16.msra.mxu1 %v377_v15  ;;  %v3580_v15 = vld [vmem:[#allocation2 + $0x38] sm:$0xff]  }
 0x125   : >> { %v477_v22 = vpop.permute.xlu0 %476  ;;  %509 = vmatprep.subr.bf16.mxu1 %v486_v20  ;;  %v475_v23 = vpop.permute.xlu1 %474 }
 0x126   : >> { %v484_v27 = vsel %vm482_vm15, %v475_v23, %v477_v22  ;;  %v483_v35 = vsel %vm482_vm15, %v4120_v56, %v475_v23 }
 0x127   : >> { %3326 = vmatmul.mubr.msk.bf16.vlgmr.msra.gmra.mxu0 %vm385_vm8, %v3572_v16  ;;  %3327 = vmatmul.mubr.msk.bf16.vlgmr.msra.gmra.mxu1 %vm385_vm8, %v3573_v19 }
 0x128   : >> { %510 = vmatpush1.bf16.msra.mxu1 %v485_v25  ;;  %529 = vmatprep.mubr.bf16.mxu1 %v5113_v18 }
 0x129   : >> { %v610_v28 = vpop.permute.xlu0 %609  ;;  %511 = vmatprep.subr.bf16.mxu1 %v484_v27  ;;  %v606_v30 = vpop.permute.xlu1 %605  ;;  %660 = vmatprep.mubr.bf16.mxu0 %v5113_v18  ;;  %v3581_v27 = vld [vmem:[#allocation2 + $0x48] sm:$0xff]  }
 0x12a   : >> { %v616_v31 = vsel %vm613_vm12, %v4125_v10, %v610_v28  ;;  %v617_v32 = vsel %vm613_vm12, %v610_v28, %v612_v3  ;;  %v614_v49 = vsel %vm613_vm12, %v4125_v10, %v606_v30  ;;  %v3578_v3 = vld [vmem:[#allocation2 + $0x30] sm:$0xff]  }
 0x12b   : >> { %640 = vmatprep.subr.bf16.mxu0 %v617_v32 }
 0x12c   : >> { %512 = vmatpush1.bf16.msra.mxu1 %v483_v35  ;;  %641 = vmatpush1.bf16.msra.mxu0 %v616_v31  ;;  %v3582_v35 = vld [vmem:[#allocation2 + $0x50] sm:$0xff]  }
 0x12d   : >> { %v608_v37 = vpop.permute.xlu0 %607  ;;  %v4143_v39 = vpop.permute.xlu1 %720 }
 0x12e   : >> { %5221 = vst [vmem:[#allocation26_spill] sm:$0xff] %v4143_v39  ;;  %v615_v46 = vsel %vm613_vm12, %v606_v30, %v608_v37 }
 0x12f   : >> { %3330 = vmatmul.mubr.msk.bf16.vlgmr.msra.gmra.mxu1 %vm385_vm8, %v3574_v36  ;;  %642 = vmatprep.subr.bf16.mxu0 %v615_v46 }
 0x130   : >> { %643 = vmatpush1.bf16.msra.mxu0 %v614_v49  ;;  %539 = vmatprep.mubr.bf16.mxu1 %v5113_v18 }
 0x131   : >> { %v729_v41 = vpop.permute.xlu0 %728  ;;  %v725_v40 = vpop.permute.xlu1 %724  ;;  %3344 = vmatprep.subr.msk.bf16.mxu0 %vm3342_vm9, %v3343_v43 }
 0x133   : >> { %3334 = vmatmul.mubr.msk.bf16.vlgmr.msra.gmra.mxu0 %vm385_vm8, %v3575_v52  ;;  %v3583_v52 = vld [vmem:[#allocation2 + $0x60] sm:$0xff]  }
 0x134   : >> { %670 = vmatprep.mubr.bf16.mxu0 %v5113_v18  ;;  %3347 = vmatpush1.bf16.msk.msra.mxu0 %vm3342_vm9, %v3346_v53 }
 0x135   : >> { %v4157_v54 = vpop.permute.xlu0 %922  ;;  %v727_v44 = vpop.permute.xlu1 %726  ;;  %841 = vmatprep.subr.bf16.mxu0 %v3939_v59 }
 0x136   : >> { %5222 = vst [vmem:[#allocation27_spill] sm:$0xff] %v4157_v54  ;;  %v733_v57 = vsel %vm730_vm4, %v4143_v39, %v727_v44  ;;  %v734_v60 = vsel %vm730_vm4, %v727_v44, %v729_v41 }
 0x137   : >> { %3331 = vmatmul.mubr.msk.bf16.gmra.mxu1 %vm385_vm8, %v3576_v42  ;;  %757 = vmatprep.subr.bf16.mxu1 %v734_v60  ;;  %v3584_v42 = vld [vmem:[#allocation2 + $0x58] sm:$0xff]  }
 0x138   : >> { %758 = vmatpush1.bf16.msra.mxu1 %v733_v57  ;;  %777 = vmatprep.mubr.bf16.mxu1 %v5113_v18 }
 0x139   : >> { %v723_v38 = vpop.permute.xlu0 %722  ;;  %v4165_v63 = vpop.permute.xlu1 %1037  ;;  %842 = vmatpush1.bf16.msra.mxu0 %v3973_v12 }
 0x13a   : >> { %5223 = vst [vmem:[#allocation28_spill] sm:$0xff] %v4165_v63  ;;  %v731_v59 = vsel %vm730_vm4, %v4143_v39, %v723_v38  ;;  %v732_v2 = vsel %vm730_vm4, %v723_v38, %v725_v40 }
 0x13b   : >> { %3335 = vmatmul.mubr.msk.bf16.gmra.mxu0 %vm385_vm8, %v3577_v29  ;;  %759 = vmatprep.subr.bf16.mxu1 %v732_v2  ;;  %v3585_v29 = vld [vmem:[#allocation2 + $0x68] sm:$0xff]  }
 0x13c   : >> { %760 = vmatpush1.bf16.msra.mxu1 %v731_v59  ;;  %859 = vmatprep.mubr.bf16.mxu0 %v5113_v18 }
 0x13d   : >> { %v925_v4 = vpop.permute.xlu0 %924  ;;  %v1040_v9 = vpop.permute.xlu1 %1039 }
 0x13f   : >> { %3338 = vmatmul.mubr.msk.bf16.vlgmr.msra.gmra.mxu1 %vm385_vm8, %v3578_v3 }
 0x140   : >> { %787 = vmatprep.mubr.bf16.mxu1 %v5113_v18 }
 0x141   : >> { %v4175_v12 = vpop.permute.xlu0 %1137  ;;  %v919_v13 = vpop.permute.xlu1 %918 }
 0x142   : >> { %5224 = vst [vmem:[#allocation29_spill] sm:$0xff] %v4175_v12 }
 0x143   : >> { %3348 = vmatmul.mubr.msk.bf16.vlgmr.msra.gmra.mxu0 %vm385_vm8, %v3579_v11 }
 0x144   : >> { %869 = vmatprep.mubr.bf16.mxu0 %v5113_v18 }
 0x145   : >> { %v1042_v16 = vpop.permute.xlu0 %1041  ;;  %v927_v19 = vpop.permute.xlu1 %926 }
 0x146   : >> { %v1045_v20 = vsel %vm576_vm14, %v1040_v9, %v1042_v16  ;;  %v930_v22 = vsel %vm693_vm5, %v925_v4, %v927_v19  ;;  %v931_v23 = vsel %vm693_vm5, %v927_v19, %v4157_v54  ;;  %v1046_v25 = vsel %vm576_vm14, %v1042_v16, %v4165_v63  ;;  %v3586_v9 = vld [vmem:[#allocation2 + $0x70] sm:$0xff]   ;;  %v3587_v19 = vld [vmem:[#allocation2 + $0x80] sm:$0xff]  }
 0x147   : >> { %3339 = vmatmul.mubr.msk.bf16.gmra.mxu1 %vm385_vm8, %v3580_v15  ;;  %954 = vmatprep.subr.bf16.mxu1 %v931_v23 }
 0x148   : >> { %1069 = vmatprep.subr.bf16.mxu0 %v1046_v25  ;;  %955 = vmatpush1.bf16.msra.mxu1 %v930_v22  ;;  %v3589_v22 = vld [vmem:[#allocation2 + $0x88] sm:$0xff]  }
 0x149   : >> { %1070 = vmatpush1.bf16.msra.mxu0 %v1045_v20  ;;  %v921_v28 = vpop.permute.xlu0 %920  ;;  %v1034_v30 = vpop.permute.xlu1 %1033  ;;  %974 = vmatprep.mubr.bf16.mxu1 %v5113_v18  ;;  %v3588_v20 = vld [vmem:[#allocation2 + $0x78] sm:$0xff]  }
 0x14a   : >> { %v928_v31 = vsel %vm693_vm5, %v919_v13, %v921_v28  ;;  %v929_v32 = vsel %vm693_vm5, %v921_v28, %v4157_v54 }
 0x14b   : >> { %3349 = vmatmul.mubr.msk.bf16.gmra.mxu0 %vm385_vm8, %v3581_v27  ;;  %956 = vmatprep.subr.bf16.mxu1 %v929_v32 }
 0x14c   : >> { %957 = vmatpush1.bf16.msra.mxu1 %v928_v31  ;;  %1089 = vmatprep.mubr.bf16.mxu0 %v5113_v18 }
 0x14d   : >> { %v1036_v36 = vpop.permute.xlu0 %1035  ;;  %v1142_v37 = vpop.permute.xlu1 %1141 }
 0x14e   : >> { %v1043_v43 = vsel %vm576_vm14, %v1034_v30, %v1036_v36  ;;  %v1044_v46 = vsel %vm576_vm14, %v1036_v36, %v4165_v63  ;;  %v1147_v49 = vsel %vm1143_vm6, %v1142_v37, %v4175_v12 }
 0x14f   : >> { %3352 = vmatmul.mubr.msk.bf16.vlgmr.msra.gmra.mxu1 %vm385_vm8, %v3582_v35  ;;  %1071 = vmatprep.subr.bf16.mxu0 %v1044_v46 }
 0x150   : >> { %1170 = vmatprep.subr.bf16.mxu1 %v1147_v49  ;;  %1072 = vmatpush1.bf16.msra.mxu0 %v1043_v43 }
 0x151   : >> { %v1140_v53 = vpop.permute.xlu0 %1139  ;;  %v4198_v41 = vpop.permute.xlu1 %1253  ;;  %984 = vmatprep.mubr.bf16.mxu1 %v5113_v18 }
 0x152   : >> { %5225 = vst [vmem:[#allocation30_spill] sm:$0xff] %v4198_v41  ;;  %v1146_v40 = vsel %vm1143_vm6, %v1140_v53, %v1142_v37 }
 0x153   : >> { %3356 = vmatmul.mubr.msk.bf16.vlgmr.msra.gmra.mxu0 %vm385_vm8, %v3583_v52  ;;  %1171 = vmatpush1.bf16.msra.mxu1 %v1146_v40 }
 0x154   : >> { %1099 = vmatprep.mubr.bf16.mxu0 %v5113_v18 }
 0x155   : >> { %v1136_v44 = vpop.permute.xlu0 %1135  ;;  %v1256_v57 = vpop.permute.xlu1 %1255 }
 0x156   : >> { %v1145_v60 = vsel %vm1143_vm6, %v1136_v44, %v4175_v12 }
 0x157   : >> { %3353 = vmatmul.mubr.msk.bf16.gmra.mxu1 %vm385_vm8, %v3584_v42  ;;  %1172 = vmatprep.subr.bf16.mxu1 %v1145_v60 }
 0x158   : >> { %1190 = vmatprep.mubr.bf16.mxu1 %v5113_v18 }
 0x159   : >> { %v1258_v38 = vpop.permute.xlu0 %1257  ;;  %v1134_v59 = vpop.permute.xlu1 %1133 }
 0x15a   : >> { %v1261_v2 = vsel %vm5164_vm10, %v1256_v57, %v1258_v38  ;;  %v1144_v3 = vsel %vm1143_vm6, %v1134_v59, %v1136_v44  ;;  %v1262_v4 = vsel %vm5164_vm10, %v1258_v38, %v4198_v41 }
 0x15b   : >> { %3357 = vmatmul.mubr.msk.bf16.gmra.mxu0 %vm385_vm8, %v3585_v29  ;;  %1173 = vmatpush1.bf16.msra.mxu1 %v1144_v3 }
 0x15c   : >> { %1285 = vmatprep.subr.bf16.mxu0 %v1262_v4  ;;  %1305 = vmatprep.mubr.bf16.mxu0 %v5113_v18 }
 0x15d   : >> { %1286 = vmatpush1.bf16.msra.mxu0 %v1261_v2  ;;  %v1252_v11 = vpop.permute.xlu0 %1251  ;;  %v1250_v13 = vpop.permute.xlu1 %1249 }
 0x15e   : >> { %v1259_v15 = vsel %vm5164_vm10, %v1250_v13, %v1252_v11  ;;  %v1260_v16 = vsel %vm5164_vm10, %v1252_v11, %v4198_v41 }
 0x15f   : >> { %3360 = vmatmul.mubr.msk.bf16.vlgmr.msra.gmra.mxu1 %vm385_vm8, %v3586_v9  ;;  %1287 = vmatprep.subr.bf16.mxu0 %v1260_v16 }
 0x160   : >> { %1200 = vmatprep.mubr.bf16.mxu1 %v5113_v18 }
 0x161   : >> { %1288 = vmatpush1.bf16.msra.mxu0 %v1259_v15 }
 0x164   : >> { %3364 = vmatmul.mubr.msk.bf16.vlgmr.msra.gmra.mxu0 %vm385_vm8, %v3587_v19 }
 0x165   : >> { %1315 = vmatprep.mubr.bf16.mxu0 %v5113_v18 }
 0x167   : >> { %3361 = vmatmul.mubr.msk.bf16.gmra.mxu1 %vm385_vm8, %v3588_v20 }
 0x168   : >> { %1432 = vmatprep.mubr.bf16.mxu1 %v5113_v18 }
 0x16c   : >> { %3365 = vmatmul.mubr.msk.bf16.gmra.mxu0 %vm385_vm8, %v3589_v22 }
 0x16d   : >> { %1534 = vmatprep.mubr.bf16.mxu0 %v5113_v18 }
 0x1e7   : >> { %v4225_v23 = vpop.f32.mrf.mxu0  ;;  %v436_v25 = vpop.f32.mrf.mxu1 }
 0x1e8   : >> { %v449_v62 = vadd.f32 %v436_v25, %v317_v50 }
 0x1e9   : >> { %v4227_v27 = vpop.f32.mrf.mxu0  ;;  %v4229_v28 = vpop.f32.mrf.mxu1 }
 0x1eb   : >> { %v4231_v30 = vpop.f32.mrf.mxu1  ;;  %v430_v31 = vpop.f32.mrf.mxu0 }
 0x1ec   : >> { %v447_v61 = vadd.f32 %v430_v31, %v315_v48  ;;  %v451_v50 = vadd.f32 %v4231_v30, %v319_v21  ;;  %v446_v48 = vadd.f32 %v4227_v27, %v314_v14 }
 0x1ed   : >> { %v4233_v32 = vpop.f32.mrf.mxu1  ;;  %v432_v36 = vpop.f32.mrf.mxu0 }
 0x1ee   : >> { %v452_v31 = vadd.f32 %v4233_v32, %v320_v1 }
 0x1ef   : >> { %v4235_v35 = vpop.f32.mrf.mxu1 }
 0x1f1   : >> { %v4237_v37 = vpop.f32.mrf.mxu1 }
 0x1f3   : >> { %v535_v43 = vpop.f32.mrf.mxu1  ;;  %v4239_v46 = vpop.f32.mrf.mxu0 }
 0x1f4   : >> { %v552_v25 = vadd.f32 %v535_v43, %v447_v61  ;;  %v551_v61 = vadd.f32 %v4237_v37, %v446_v48 }
 0x1f5   : >> { %v4241_v49 = vpop.f32.mrf.mxu1  ;;  %v4243_v52 = vpop.f32.mrf.mxu0 }
 0x1f7   : >> { %v541_v53 = vpop.f32.mrf.mxu1  ;;  %v4245_v40 = vpop.f32.mrf.mxu0 }
 0x1f9   : >> { %v4247_v42 = vpop.f32.mrf.mxu1  ;;  %v4249_v44 = vpop.f32.mrf.mxu0 }
 0x1fb   : >> { %v545_v57 = vpop.f32.mrf.mxu1  ;;  %v672_v60 = vpop.f32.mrf.mxu0 }
 0x1fd   : >> { %v4251_v29 = vpop.f32.mrf.mxu1  ;;  %v4253_v38 = vpop.f32.mrf.mxu0 }
 0x1fe   : >> { %v557_v14 = vadd.f32 %v4251_v29, %v452_v31 }
 0x1ff   : >> { %v4255_v59 = vpop.f32.mrf.mxu0  ;;  %v4257_v2 = vpop.f32.mrf.mxu1 }
 0x201   : >> { %v4259_v3 = vpop.f32.mrf.mxu0  ;;  %v4261_v4 = vpop.f32.mrf.mxu1 }
 0x203   : >> { %v4263_v9 = vpop.f32.mrf.mxu1  ;;  %v4265_v11 = vpop.f32.mrf.mxu0 }
 0x205   : >> { %v4267_v13 = vpop.f32.mrf.mxu1  ;;  %v4269_v15 = vpop.f32.mrf.mxu0 }
 0x207   : >> { %v789_v16 = vpop.f32.mrf.mxu1  ;;  %v4271_v19 = vpop.f32.mrf.mxu0 }
 0x209   : >> { %v4273_v20 = vpop.f32.mrf.mxu1  ;;  %v4275_v22 = vpop.f32.mrf.mxu0 }
 0x20b   : >> { %v4277_v0 = vpop.f32.mrf.mxu1  ;;  %v4279_v51 = vpop.f32.mrf.mxu0 }
 0x20d   : >> { %v4281_v58 = vpop.f32.mrf.mxu1  ;;  %v4283_v18 = vpop.f32.mrf.mxu0 }
 0x20f   : >> { %v4285_v5 = vpop.f32.mrf.mxu0  ;;  %v4287_v6 = vpop.f32.mrf.mxu1 }
 0x211   : >> { %v4289_v7 = vpop.f32.mrf.mxu0  ;;  %v4291_v8 = vpop.f32.mrf.mxu1 }
 0x212   : >> { %5226 = vst [vmem:[#allocation31_spill] sm:$0xff] %v4291_v8  ;;  %v554_v8 = vadd.f32 %v541_v53, %v449_v62 }
 0x213   : >> { %v4293_v47 = vpop.f32.mrf.mxu1  ;;  %v4295_v45 = vpop.f32.mrf.mxu0 }
 0x214   : >> { %5227 = vst [vmem:[#allocation32_spill] sm:$0xff] %v4295_v45  ;;  %v450_v45 = vadd.f32 %v4229_v28, %v318_v17  ;;  %v556_v17 = vadd.f32 %v545_v57, %v451_v50 }
 0x215   : >> { %v4297_v41 = vpop.f32.mrf.mxu1  ;;  %v4299_v12 = vpop.f32.mrf.mxu0 }
 0x216   : >> { %5228 = vst [vmem:[#allocation33_spill] sm:$0xff] %v4299_v12 }
 0x217   : >> { %v4301_v63 = vpop.f32.mrf.mxu1  ;;  %v4303_v54 = vpop.f32.mrf.mxu0 }
 0x219   : >> { %v4305_v39 = vpop.f32.mrf.mxu1  ;;  %v4307_v10 = vpop.f32.mrf.mxu0 }
 0x21a   : >> { %5229 = vst [vmem:[#allocation34_spill] sm:$0xff] %v4307_v10  ;;  %v448_v10 = vadd.f32 %v432_v36, %v316_v26  ;;  %v555_v26 = vadd.f32 %v4247_v42, %v450_v45 }
 0x21b   : >> { %v4309_v56 = vpop.f32.mrf.mxu1  ;;  %v4311_v55 = vpop.f32.mrf.mxu0 }
 0x21c   : >> { %5230 = vst [vmem:[#allocation35_spill] sm:$0xff] %v4309_v56  ;;  %5231 = vst [vmem:[#allocation36_spill] sm:$0xff] %v4311_v55 }
 0x21d   : >> { %v4325_v24 = vpop.f32.mrf.mxu1  ;;  %v4327_v33 = vpop.f32.mrf.mxu0 }
 0x21e   : >> { %5232 = vst [vmem:[#allocation37_spill] sm:$0xff] %v4325_v24  ;;  %5233 = vst [vmem:[#allocation38_spill] sm:$0xff] %v4327_v33  ;;  %v445_v24 = vadd.f32 %v4225_v23, %v313_v34  ;;  %v683_v34 = vadd.f32 %v4245_v40, %v552_v25  ;;  %v685_v23 = vadd.f32 %v672_v60, %v554_v8 }
 0x21f   : >> { %v4341_v12 = vpop.f32.mrf.mxu0  ;;  %v4343_v33 = vpop.f32.mrf.mxu1  ;;  %v682_v8 = vadd.f32 %v4243_v52, %v551_v61 }
 0x220   : >> { %5234 = vst [vmem:[#allocation39_spill] sm:$0xff] %v4341_v12  ;;  %5235 = vst [vmem:[#allocation40_spill] sm:$0xff] %v4343_v33  ;;  %v550_v12 = vadd.f32 %v4235_v35, %v445_v24  ;;  %v553_v33 = vadd.f32 %v4241_v49, %v448_v10  ;;  %v686_v24 = vadd.f32 %v4253_v38, %v555_v26 }
 0x221   : >> { %v1107_v55 = vpop.f32.mrf.mxu0  ;;  %v4348_v56 = vpop.f32.mrf.mxu1  ;;  %v687_v10 = vadd.f32 %v4255_v59, %v556_v17  ;;  %v800_v27 = vadd.f32 %v4263_v9, %v683_v34  ;;  %v802_v30 = vadd.f32 %v789_v16, %v685_v23  ;;  %v688_v35 = vadd.f32 %v4259_v3, %v557_v14  ;;  %v5244_v34 = vld [vmem:[#allocation33_spill] sm:$0xff] }
 0x222   : >> { %v681_v62 = vadd.f32 %v4239_v46, %v550_v12  ;;  %v684_v28 = vadd.f32 %v4249_v44, %v553_v33  ;;  %v803_v37 = vadd.f32 %v4273_v20, %v686_v24  ;;  %v799_v53 = vadd.f32 %v4261_v4, %v682_v8  ;;  %v5240_v20 = vld [vmem:[#allocation34_spill] sm:$0xff] }
 0x223   : >> { %v1196_v21 = vpop.f32.mrf.mxu1  ;;  %v882_v36 = vadd.f32 %v4271_v19, %v800_v27  ;;  %v804_v43 = vadd.f32 %v4277_v0, %v687_v10  ;;  %v884_v46 = vadd.f32 %v4279_v51, %v802_v30  ;;  %v805_v42 = vadd.f32 %v4281_v58, %v688_v35  ;;  %v5236_v9 = vld [vmem:[#allocation35_spill] sm:$0xff]  ;;  %v5239_v19 = vld [vmem:[#allocation32_spill] sm:$0xff] }
 0x224   : >> { %v1307_v1 = vpop.f32.mrf.mxu0  ;;  %v798_v32 = vadd.f32 %v4257_v2, %v681_v62  ;;  %v801_v12 = vadd.f32 %v4267_v13, %v684_v28  ;;  %v885_v57 = vadd.f32 %v4283_v18, %v803_v37  ;;  %v881_v51 = vadd.f32 %v4269_v15, %v799_v53 }
 0x225   : >> { %v1198_v45 = vpop.f32.mrf.mxu1  ;;  %v886_v60 = vadd.f32 %v4285_v5, %v804_v43  ;;  %v997_v29 = vadd.f32 %v4293_v47, %v882_v36  ;;  %v999_v0 = vadd.f32 %v4301_v63, %v884_v46  ;;  %v887_v2 = vadd.f32 %v4289_v7, %v805_v42  ;;  %v5238_v63 = vld [vmem:[#allocation31_spill] sm:$0xff] }
 0x226   : >> { %v1309_v33 = vpop.f32.mrf.mxu0  ;;  %v880_v52 = vadd.f32 %v4265_v11, %v798_v32  ;;  %v883_v40 = vadd.f32 %v4275_v22, %v801_v12  ;;  %v1000_v18 = vadd.f32 %v4305_v39, %v885_v57  ;;  %v5237_v11 = vld [vmem:[#allocation36_spill] sm:$0xff]  ;;  %v996_v16 = vadd.f32 %v5238_v63, %v881_v51  ;;  %v5241_v22 = vld [vmem:[#allocation37_spill] sm:$0xff] }
 0x227   : >> { %v1202_v49 = vpop.f32.mrf.mxu1  ;;  %v1112_v58 = vadd.f32 %v4303_v54, %v997_v29  ;;  %v1001_v5 = vadd.f32 %v5236_v9, %v886_v60  ;;  %v1114_v47 = vadd.f32 %v5237_v11, %v999_v0  ;;  %v1002_v7 = vadd.f32 %v5241_v22, %v887_v2  ;;  %v5243_v48 = vld [vmem:[#allocation39_spill] sm:$0xff]  ;;  %v5245_v17 = vld [vmem:[#allocation40_spill] sm:$0xff] }
 0x228   : >> { %v1311_v44 = vpop.f32.mrf.mxu0  ;;  %v995_v59 = vadd.f32 %v4287_v6, %v880_v52  ;;  %v998_v3 = vadd.f32 %v4297_v41, %v883_v40  ;;  %v5242_v41 = vld [vmem:[#allocation38_spill] sm:$0xff]  ;;  %v1111_v26 = vadd.f32 %v5244_v34, %v996_v16  ;;  %v5254_v11 = vld [vmem:[#allocation16_spill] sm:$0xff]  ;;  %v5270_v34 = vld [vmem:[#allocation21_spill] sm:$0xff] }
 0x229   : >> { %v1204_v38 = vpop.f32.mrf.mxu1  ;;  %v1115_v25 = vadd.f32 %v5242_v41, %v1000_v18  ;;  %v1116_v54 = vadd.f32 %v5243_v48, %v1001_v5  ;;  %v1213_v31 = vadd.f32 %v1196_v21, %v1112_v58  ;;  %v1215_v39 = vadd.f32 %v1202_v49, %v1114_v47  ;;  %v5250_v58 = vld [vmem:[#allocation12_spill] sm:$0xff] }
 0x22a   : >> { %v1313_v4 = vpop.f32.mrf.mxu0  ;;  %v1110_v15 = vadd.f32 %v5239_v19, %v995_v59  ;;  %v1113_v6 = vadd.f32 %v5240_v20, %v998_v3  ;;  %v1117_v61 = vadd.f32 %v1107_v55, %v1002_v7  ;;  %v1212_v8 = vadd.f32 %v4348_v56, %v1111_v26  ;;  %v5248_v3 = vld [vmem:[#allocation14_spill] sm:$0xff] }
 0x22b   : >> { %v1206_v13 = vpop.f32.mrf.mxu1  ;;  %v1328_v24 = vadd.f32 %v1311_v44, %v1213_v31  ;;  %v1216_v10 = vadd.f32 %v1204_v38, %v1115_v25  ;;  %vm5249_vm7 = vcmp.ne.s16.totalorder %v5248_v3, 0  ;;  %vm5251_vm9 = vcmp.ne.s16.totalorder %v5250_v58, 0  ;;  %v5267_v25 = vld [vmem:[#allocation20_spill] sm:$0xff] }
 0x22c   : >> { %v1317_v50 = vpop.f32.mrf.mxu0  ;;  %v1211_v23 = vadd.f32 %v5245_v17, %v1110_v15  ;;  %v1214_v62 = vadd.f32 %v1198_v45, %v1113_v6  ;;  %v1217_v27 = vadd.f32 %v1206_v13, %v1116_v54  ;;  %v1327_v43 = vadd.f32 %v1309_v33, %v1212_v8  ;;  %v5256_v13 = vld [vmem:[#allocation15_spill] sm:$0xff]  ;;  %v5262_v6 = vld [vmem:[#allocation17_spill] sm:$0xff]  ;;  %v5272_v17 = vld [vmem:[#allocation22_spill] sm:$0xff] }
 0x22d   : >> { %v1208_v28 = vpop.f32.mrf.mxu1  ;;  %v1330_v30 = vadd.f32 %v1317_v50, %v1215_v39  ;;  %v1336_v49 = vmax.f32 %v1328_v24, 0.0  ;;  %v5260_v15 = vld [vmem:[#allocation19_spill] sm:$0xff]  ;;  %v5265_v50 = vld [vmem:[#allocation18_spill] sm:$0xff]  ;;  %v3367_v3 = vld [vmem:[%s5094_s2 + $0x48] sm:$0xff] }
 0x22e   : >> { %v1319_v14 = vpop.f32.mrf.mxu0  ;;  %v1326_v32 = vadd.f32 %v1307_v1, %v1211_v23  ;;  %v1329_v12 = vadd.f32 %v1313_v4, %v1214_v62  ;;  %v1218_v36 = vadd.f32 %v1208_v28, %v1117_v61  ;;  %v1335_v60 = vmax.f32 %v1327_v43, 0.0  ;;  %v5281_v43 = vld [vmem:[#allocation24_spill] sm:$0xff] }
 0x22f   : >> { %v1331_v21 = vadd.f32 %v1319_v14, %v1216_v10  ;;  %v1338_v53 = vmax.f32 %v1330_v30, 0.0  ;;  %v5277_v10 = vld [vmem:[#allocation23_spill] sm:$0xff] }
 0x230   : >> { %v1321_v35 = vpop.f32.mrf.mxu0  ;;  %v1334_v52 = vmax.f32 %v1326_v32, 0.0  ;;  %v1337_v40 = vmax.f32 %v1329_v12, 0.0 }
 0x231   : >> { %v1332_v37 = vadd.f32 %v1321_v35, %v1217_v27  ;;  %v1339_v42 = vmax.f32 %v1331_v21, 0.0 }
 0x232   : >> { %v1323_v46 = vpop.f32.mrf.mxu0  ;;  %v4398_v56 = vpack.c.bf16 %v1336_v49, %v1334_v52  ;;  %v4406_v0 = vpack.c.bf16 %v1337_v40, %v1335_v60  ;;  %v3591_v52 = vld [vmem:[#allocation2 + $0x98] sm:$0xff]   ;;  %v3592_v60 = vld [vmem:[#allocation2 + $0xa0] sm:$0xff]  }
 0x233   : >> { %v1340_v55 = vmax.f32 %v1332_v37, 0.0  ;;  %v1333_v45 = vadd.f32 %v1323_v46, %v1218_v36  ;;  %v3590_v36 = vld [vmem:[#allocation2 + $0x90] sm:$0xff]  }
 0x234   : >> { %v1355_v59 = vsel %vm5163_vm13, %v4398_v56, 0  ;;  %v1356_v2 = vsel %vm5162_vm11, %v4406_v0, 0 }
 0x235   : >> { %v4396_v44 = vpack.c.bf16 %v1340_v55, %v1338_v53  ;;  %v1341_v57 = vmax.f32 %v1333_v45, 0.0  ;;  %v5282_v53 = vmov 0  }
 0x237   : >> { %v4400_v1 = vpack.c.bf16 %v1341_v57, %v1339_v42  ;;  %v1357_v33 = vsel %vm5163_vm13, %v4396_v44, 0  ;;  %v1565_v4 = vsel %vm5249_vm7, %v4396_v44, 0  ;;  %vm5255_vm13 = vcmp.ne.s16.totalorder %v5254_v11, 0 }
 0x238   : >> { %1382 = vrot.lane.b32.xlu0 %v1357_v33, %s3746_s9  ;;  %v1671_v47 = vsel %vm5255_vm13, %v4396_v44, 0 }
 0x239   : >> { %v1358_v51 = vsel %vm5162_vm11, %v4400_v1, 0  ;;  %v1566_v18 = vsel %vm5251_vm9, %v4400_v1, 0  ;;  %vm5252_vm11 = vmmov %vm5249_vm7 }
 0x23a   : >> { %1384 = vrot.lane.b32.xlu1 %v1358_v51, %s3746_s9  ;;  %v1563_v9 = vsel %vm5252_vm11, %v4398_v56, 0  ;;  %vm5253_vm7 = vmmov %vm5251_vm9  ;;  %vm5257_vm9 = vcmp.ne.s16.totalorder %v5256_v13, 0  ;;  %v5283_v51 = vld [vmem:[#allocation25_spill] sm:$0xff] }
 0x23b   : >> { %v1564_v5 = vsel %vm5253_vm7, %v4406_v0, 0  ;;  %v1672_v63 = vsel %vm5257_vm9, %v4400_v1, 0  ;;  %vm5258_vm11 = vmmov %vm5255_vm13  ;;  %vm5261_vm13 = vcmp.ne.s16.totalorder %v5260_v15, 0  ;;  %v3371_v15 = vld [vmem:[%s5094_s2 + $0x68] sm:$0xff]  ;;  %v3372_v13 = vld [vmem:[%s5094_s2 + $0x70] sm:$0xff] }
 0x23c   : >> { %1378 = vrot.lane.b32.xlu0 %v1355_v59, %s3746_s9  ;;  %v1669_v16 = vsel %vm5258_vm11, %v4398_v56, 0  ;;  %vm5259_vm7 = vmmov %vm5257_vm9  ;;  %v1858_v20 = vsel %vm5261_vm13, %v4406_v0, 0  ;;  %vm5263_vm9 = vcmp.ne.s16.totalorder %v5262_v6, 0  ;;  %v3369_v6 = vld [vmem:[%s5094_s2 + $0x58] sm:$0xff] }
 0x23d   : >> { %v1670_v19 = vsel %vm5259_vm7, %v4406_v0, 0  ;;  %v1859_v22 = vsel %vm5263_vm9, %v4396_v44, 0  ;;  %vm5264_vm11 = vmmov %vm5261_vm13  ;;  %vm5266_vm7 = vcmp.ne.s16.totalorder %v5265_v50, 0  ;;  %vm5268_vm13 = vcmp.ne.s16.totalorder %v5267_v25, 0  ;;  %v3366_v50 = vld [vmem:[%s5094_s2 + $0x40] sm:$0xff] }
 0x23e   : >> { %1380 = vrot.lane.b32.xlu1 %v1356_v2, %s3746_s9  ;;  %v1860_v7 = vsel %vm5264_vm11, %v4400_v1, 0  ;;  %v1965_v41 = vsel %vm5266_vm7, %v4396_v44, 0  ;;  %v1966_v48 = vsel %vm5268_vm13, %v4400_v1, 0  ;;  %v1857_v54 = vsel %vm5263_vm9, %v4398_v56, 0  ;;  %vm5269_vm11 = vmmov %vm5268_vm13 }
 0x23f   : >> { %v1964_v31 = vsel %vm5269_vm11, %v4406_v0, 0  ;;  %v1963_v39 = vsel %vm5266_vm7, %v4398_v56, 0  ;;  %vm5271_vm13 = vcmp.ne.s16.totalorder %v5270_v34, 0  ;;  %vm5273_vm9 = vcmp.ne.s16.totalorder %v5272_v17, 0  ;;  %v3370_v17 = vld [vmem:[%s5094_s2 + $0x60] sm:$0xff] }
 0x240   : >> { %1484 = vrot.lane.b32.xlu0 %v4396_v44, %s3747_s10  ;;  %v2169_v26 = vsel %vm5271_vm13, %v4396_v44, 0  ;;  %v2170_v23 = vsel %vm5273_vm9, %v4400_v1, 0  ;;  %vm5274_vm11 = vmmov %vm5273_vm9 }
 0x241   : >> { %v2168_v61 = vsel %vm5274_vm11, %v4406_v0, 0  ;;  %vm5275_vm7 = vmmov %vm5271_vm13  ;;  %vm5276_vm13 = vcmask 138240  }
 0x242   : >> { %1486 = vrot.lane.b32.xlu1 %v4400_v1, %s3747_s10  ;;  %v2167_v62 = vsel %vm5275_vm7, %v4398_v56, 0  ;;  %vm5278_vm9 = vmmov %vm5276_vm13 }
 0x243   : >> { %vm5279_vm11 = vmmov %vm5278_vm9 }
 0x244   : >> { %1590 = vrot.lane.b32.xlu0 %v1565_v4, %s3745_s8  ;;  %vm5280_vm10 = vmmov %vm5278_vm9 }
 0x246   : >> { %1482 = vrot.lane.b32.xlu1 %v4406_v0, %s3747_s10 }
 0x248   : >> { %1480 = vrot.lane.b32.xlu0 %v4398_v56, %s3747_s10 }
 0x24a   : >> { %1592 = vrot.lane.b32.xlu1 %v1566_v18, %s3745_s8 }
 0x24c   : >> { %1586 = vrot.lane.b32.xlu0 %v1563_v9, %s3745_s8 }
 0x24e   : >> { %1588 = vrot.lane.b32.xlu1 %v1564_v5, %s3745_s8 }
 0x250   : >> { %1696 = vrot.lane.b32.xlu0 %v1671_v47, %s3744_s7  ;;  %v3593_v47 = vld [vmem:[#allocation2 + $0xb0] sm:$0xff]  }
 0x252   : >> { %1698 = vrot.lane.b32.xlu1 %v1672_v63, %s3744_s7 }
 0x254   : >> { %1692 = vrot.lane.b32.xlu0 %v1669_v16, %s3744_s7  ;;  %v3594_v16 = vld [vmem:[#allocation2 + $0xa8] sm:$0xff]  }
 0x256   : >> { %1694 = vrot.lane.b32.xlu1 %v1670_v19, %s3744_s7 }
 0x258   : >> { %1882 = vrot.lane.b32.xlu0 %v1858_v20, %s3743_s6  ;;  %v5284_v20 = vld [vmem:[#allocation26_spill] sm:$0xff] }
 0x25a   : >> { %1884 = vrot.lane.b32.xlu1 %v1859_v22, %s3743_s6 }
 0x25c   : >> { %1886 = vrot.lane.b32.xlu0 %v1860_v7, %s3743_s6 }
 0x25e   : >> { %1990 = vrot.lane.b32.xlu1 %v1965_v41, %s3742_s5 }
 0x260   : >> { %1992 = vrot.lane.b32.xlu0 %v1966_v48, %s3742_s5 }
 0x262   : >> { %1880 = vrot.lane.b32.xlu1 %v1857_v54, %s3743_s6 }
 0x264   : >> { %1988 = vrot.lane.b32.xlu0 %v1964_v31, %s3742_s5  ;;  %v3595_v31 = vld [vmem:[#allocation2 + $0xb8] sm:$0xff]  }
 0x266   : >> { %1986 = vrot.lane.b32.xlu1 %v1963_v39, %s3742_s5  ;;  %v3596_v39 = vld [vmem:[#allocation2 + $0xc0] sm:$0xff]  }
 0x268   : >> { %2090 = vrot.lane.b32.xlu0 %v4400_v1, %s3748_s21 }
 0x26a   : >> { %2088 = vrot.lane.b32.xlu1 %v4396_v44, %s3748_s21 }
 0x26c   : >> { %2086 = vrot.lane.b32.xlu0 %v4406_v0, %s3748_s21 }
 0x26e   : >> { %2194 = vrot.lane.b32.xlu1 %v2169_v26, %s3741_s4 }
 0x270   : >> { %2196 = vrot.lane.b32.xlu0 %v2170_v23, %s3741_s4  ;;  %v5285_v23 = vld [vmem:[#allocation27_spill] sm:$0xff] }
 0x272   : >> { %2084 = vrot.lane.b32.xlu1 %v4398_v56, %s3748_s21 }
 0x274   : >> { %2192 = vrot.lane.b32.xlu0 %v2168_v61, %s3741_s4 }
 0x276   : >> { %2190 = vrot.lane.b32.xlu1 %v2167_v62, %s3741_s4 }
 0x2aa   : >> { %v1383_v28 = vpop.permute.xlu0 %1382 }
 0x2ab   : >> { %v1388_v27 = vsel %vm5278_vm9, %v5277_v10, %v1383_v28 }
 0x2ac   : >> { %v1385_v14 = vpop.permute.xlu1 %1384 }
 0x2ad   : >> { %v1389_v24 = vsel %vm5276_vm13, %v1383_v28, %v1385_v14  ;;  %v3597_v14 = vld [vmem:[#allocation2 + $0xd0] sm:$0xff]  }
 0x2ae   : >> { %v1379_v30 = vpop.permute.xlu0 %1378  ;;  %1412 = vmatprep.subr.bf16.mxu1 %v1389_v24  ;;  %v5286_v24 = vld [vmem:[#allocation28_spill] sm:$0xff] }
 0x2af   : >> { %1413 = vmatpush1.bf16.msra.mxu1 %v1388_v27  ;;  %v1386_v35 = vsel %vm5280_vm10, %v5277_v10, %v1379_v30  ;;  %vm5289_vm10 = vcmask 908288   ;;  %v3368_v10 = vld [vmem:[%s5094_s2 + $0x50] sm:$0xff] }
 0x2b0   : >> { %v1381_v8 = vpop.permute.xlu1 %1380  ;;  %vm5290_vm7 = vmmov %vm5289_vm10 }
 0x2b1   : >> { %v1387_v32 = vsel %vm5279_vm11, %v1379_v30, %v1381_v8  ;;  %v3598_v8 = vld [vmem:[#allocation2 + $0xc8] sm:$0xff]   ;;  %vm5291_vm13 = vmmov %vm5290_vm7 }
 0x2b2   : >> { %v1485_v12 = vpop.permute.xlu0 %1484  ;;  %1414 = vmatprep.subr.bf16.mxu1 %v1387_v32  ;;  %vm5292_vm9 = vmmov %vm5290_vm7 }
 0x2b3   : >> { %1415 = vmatpush1.bf16.msra.mxu1 %v1386_v35  ;;  %v1490_v46 = vsel %vm482_vm15, %v5281_v43, %v1485_v12 }
 0x2b4   : >> { %v1487_v21 = vpop.permute.xlu1 %1486 }
 0x2b5   : >> { %v1491_v37 = vsel %vm482_vm15, %v1485_v12, %v1487_v21 }
 0x2b6   : >> { %v1591_v49 = vpop.permute.xlu0 %1590  ;;  %3376 = vmatmul.mubr.msk.bf16.vlgmr.msra.gmra.mxu1 %vm385_vm8, %v3590_v36  ;;  %1514 = vmatprep.subr.bf16.mxu0 %v1491_v37 }
 0x2b7   : >> { %1515 = vmatpush1.bf16.msra.mxu0 %v1490_v46  ;;  %1442 = vmatprep.mubr.bf16.mxu1 %v5282_v53  ;;  %v1596_v59 = vsel %vm613_vm12, %v5283_v51, %v1591_v49 }
 0x2b8   : >> { %v1483_v55 = vpop.permute.xlu1 %1482 }
 0x2ba   : >> { %v1481_v45 = vpop.permute.xlu0 %1480 }
 0x2bb   : >> { %v1488_v40 = vsel %vm482_vm15, %v5281_v43, %v1481_v45  ;;  %v1489_v42 = vsel %vm482_vm15, %v1481_v45, %v1483_v55  ;;  %v5287_v55 = vld [vmem:[#allocation29_spill] sm:$0xff] }
 0x2bc   : >> { %1516 = vmatprep.subr.bf16.mxu0 %v1489_v42  ;;  %v1593_v57 = vpop.permute.xlu1 %1592 }
 0x2bd   : >> { %1517 = vmatpush1.bf16.msra.mxu0 %v1488_v40  ;;  %v1597_v33 = vsel %vm613_vm12, %v1591_v49, %v1593_v57  ;;  %v3599_v49 = vld [vmem:[#allocation2 + $0xd8] sm:$0xff]   ;;  %v3600_v40 = vld [vmem:[#allocation2 + $0xe0] sm:$0xff]  }
 0x2be   : >> { %v1587_v2 = vpop.permute.xlu0 %1586  ;;  %3377 = vmatmul.mubr.msk.bf16.gmra.mxu1 %vm385_vm8, %v3591_v52  ;;  %1620 = vmatprep.subr.bf16.mxu1 %v1597_v33 }
 0x2bf   : >> { %1621 = vmatpush1.bf16.msra.mxu1 %v1596_v59  ;;  %1640 = vmatprep.mubr.bf16.mxu1 %v5282_v53  ;;  %v1594_v9 = vsel %vm613_vm12, %v5283_v51, %v1587_v2 }
 0x2c0   : >> { %3380 = vmatmul.mubr.msk.bf16.vlgmr.msra.gmra.mxu0 %vm385_vm8, %v3592_v60  ;;  %v1589_v4 = vpop.permute.xlu1 %1588 }
 0x2c1   : >> { %v1595_v18 = vsel %vm613_vm12, %v1587_v2, %v1589_v4  ;;  %1544 = vmatprep.mubr.bf16.mxu0 %v5282_v53  ;;  %v3601_v2 = vld [vmem:[#allocation2 + $0xf0] sm:$0xff]   ;;  %v5288_v4 = vld [vmem:[#allocation30_spill] sm:$0xff] }
 0x2c2   : >> { %v1697_v5 = vpop.permute.xlu0 %1696  ;;  %1622 = vmatprep.subr.bf16.mxu1 %v1595_v18 }
 0x2c3   : >> { %1623 = vmatpush1.bf16.msra.mxu1 %v1594_v9  ;;  %v1702_v22 = vsel %vm730_vm4, %v5284_v20, %v1697_v5 }
 0x2c4   : >> { %1808 = vmatprep.subr.bf16.mxu1 %v4400_v1  ;;  %v1699_v63 = vpop.permute.xlu1 %1698 }
 0x2c5   : >> { %v1703_v19 = vsel %vm730_vm4, %v1697_v5, %v1699_v63  ;;  %v3602_v5 = vld [vmem:[#allocation2 + $0xe8] sm:$0xff]  }
 0x2c6   : >> { %v1693_v7 = vpop.permute.xlu0 %1692  ;;  %3384 = vmatmul.mubr.msk.bf16.vlgmr.msra.gmra.mxu1 %vm385_vm8, %v3593_v47  ;;  %1726 = vmatprep.subr.bf16.mxu0 %v1703_v19 }
 0x2c7   : >> { %1727 = vmatpush1.bf16.msra.mxu0 %v1702_v22  ;;  %1809 = vmatpush1.bf16.msra.mxu1 %v4396_v44  ;;  %v1700_v48 = vsel %vm730_vm4, %v5284_v20, %v1693_v7 }
 0x2c8   : >> { %3381 = vmatmul.mubr.msk.bf16.gmra.mxu0 %vm385_vm8, %v3594_v16  ;;  %1810 = vmatprep.subr.bf16.mxu1 %v4406_v0  ;;  %v1695_v41 = vpop.permute.xlu1 %1694 }
 0x2c9   : >> { %v1701_v1 = vsel %vm730_vm4, %v1693_v7, %v1695_v41  ;;  %1650 = vmatprep.mubr.bf16.mxu1 %v5282_v53  ;;  %1746 = vmatprep.mubr.bf16.mxu0 %v5282_v53  ;;  %v3603_v41 = vld [vmem:[#allocation2 + $0xf8] sm:$0xff]  }
 0x2ca   : >> { %v1883_v54 = vpop.permute.xlu0 %1882  ;;  %1728 = vmatprep.subr.bf16.mxu0 %v1701_v1  ;;  %v3604_v1 = vld [vmem:[#allocation2 + $0x100] sm:$0xff]  }
 0x2cb   : >> { %1729 = vmatpush1.bf16.msra.mxu0 %v1700_v48  ;;  %1811 = vmatpush1.bf16.msra.mxu1 %v4398_v56  ;;  %v1889_v56 = vsel %vm693_vm5, %v1883_v54, %v5285_v23  ;;  %v3605_v48 = vld [vmem:[#allocation2 + $0x110] sm:$0xff]  }
 0x2cc   : >> { %v1885_v44 = vpop.permute.xlu1 %1884 }
 0x2ce   : >> { %v1887_v26 = vpop.permute.xlu0 %1886  ;;  %3385 = vmatmul.mubr.msk.bf16.gmra.mxu1 %vm385_vm8, %v3595_v31  ;;  %v3607_v31 = vld [vmem:[#allocation2 + $0x118] sm:$0xff]  }
 0x2cf   : >> { %v1890_v0 = vsel %vm693_vm5, %v1885_v44, %v1887_v26  ;;  %v1891_v61 = vsel %vm693_vm5, %v1887_v26, %v5285_v23  ;;  %1828 = vmatprep.mubr.bf16.mxu1 %v5282_v53 }
 0x2d0   : >> { %3388 = vmatmul.mubr.msk.bf16.vlgmr.msra.gmra.mxu0 %vm385_vm8, %v3596_v39  ;;  %1914 = vmatprep.subr.bf16.mxu0 %v1891_v61  ;;  %v1991_v62 = vpop.permute.xlu1 %1990 }
 0x2d1   : >> { %1915 = vmatpush1.bf16.msra.mxu0 %v1890_v0  ;;  %1756 = vmatprep.mubr.bf16.mxu0 %v5282_v53 }
 0x2d2   : >> { %v1993_v28 = vpop.permute.xlu0 %1992  ;;  %1916 = vmatprep.subr.bf16.mxu0 %v1889_v56 }
 0x2d3   : >> { %v1997_v27 = vsel %vm576_vm14, %v1993_v28, %v5286_v24  ;;  %v1996_v35 = vsel %vm576_vm14, %v1991_v62, %v1993_v28 }
 0x2d4   : >> { %2020 = vmatprep.subr.bf16.mxu1 %v1997_v27  ;;  %v1881_v30 = vpop.permute.xlu1 %1880 }
 0x2d5   : >> { %v1888_v32 = vsel %vm693_vm5, %v1881_v30, %v1883_v54  ;;  %v3606_v54 = vld [vmem:[#allocation2 + $0x108] sm:$0xff]  }
 0x2d6   : >> { %v1989_v12 = vpop.permute.xlu0 %1988  ;;  %3392 = vmatmul.mubr.msk.bf16.vlgmr.msra.gmra.mxu1 %vm385_vm8, %v3597_v14  ;;  %1917 = vmatpush1.bf16.msra.mxu0 %v1888_v32 }
 0x2d7   : >> { %2021 = vmatpush1.bf16.msra.mxu1 %v1996_v35  ;;  %v1995_v36 = vsel %vm576_vm14, %v1989_v12, %v5286_v24  ;;  %1838 = vmatprep.mubr.bf16.mxu1 %v5282_v53 }
 0x2d8   : >> { %3389 = vmatmul.mubr.msk.bf16.gmra.mxu0 %vm385_vm8, %v3598_v8  ;;  %2022 = vmatprep.subr.bf16.mxu1 %v1995_v36  ;;  %v1987_v21 = vpop.permute.xlu1 %1986 }
 0x2d9   : >> { %v1994_v37 = vsel %vm576_vm14, %v1987_v21, %v1989_v12  ;;  %1934 = vmatprep.mubr.bf16.mxu0 %v5282_v53 }
 0x2da   : >> { %v2091_v46 = vpop.permute.xlu0 %2090 }
 0x2db   : >> { %2023 = vmatpush1.bf16.msra.mxu1 %v1994_v37  ;;  %v2095_v45 = vsel %vm1143_vm6, %v2091_v46, %v5287_v55 }
 0x2dc   : >> { %2118 = vmatprep.subr.bf16.mxu0 %v2095_v45  ;;  %v2089_v52 = vpop.permute.xlu1 %2088 }
 0x2dd   : >> { %v2094_v60 = vsel %vm1143_vm6, %v2089_v52, %v2091_v46 }
 0x2de   : >> { %v2087_v42 = vpop.permute.xlu0 %2086  ;;  %3393 = vmatmul.mubr.msk.bf16.gmra.mxu1 %vm385_vm8, %v3599_v49 }
 0x2df   : >> { %v2093_v57 = vsel %vm1143_vm6, %v2087_v42, %v5287_v55  ;;  %2040 = vmatprep.mubr.bf16.mxu1 %v5282_v53 }
 0x2e0   : >> { %3396 = vmatmul.mubr.msk.bf16.vlgmr.msra.gmra.mxu0 %vm385_vm8, %v3600_v40  ;;  %v2195_v33 = vpop.permute.xlu1 %2194 }
 0x2e1   : >> { %2119 = vmatpush1.bf16.msra.mxu0 %v2094_v60  ;;  %1944 = vmatprep.mubr.bf16.mxu0 %v5282_v53 }
 0x2e2   : >> { %2120 = vmatprep.subr.bf16.mxu0 %v2093_v57  ;;  %v2197_v59 = vpop.permute.xlu0 %2196 }
 0x2e3   : >> { %v2201_v18 = vsel %vm5289_vm10, %v2197_v59, %v5288_v4  ;;  %v2200_v63 = vsel %vm5290_vm7, %v2195_v33, %v2197_v59 }
 0x2e4   : >> { %2224 = vmatprep.subr.bf16.mxu1 %v2201_v18  ;;  %v2085_v9 = vpop.permute.xlu1 %2084 }
 0x2e5   : >> { %v2092_v47 = vsel %vm1143_vm6, %v2085_v9, %v2087_v42 }
 0x2e6   : >> { %v2193_v16 = vpop.permute.xlu0 %2192  ;;  %3400 = vmatmul.mubr.msk.bf16.vlgmr.msra.gmra.mxu1 %vm385_vm8, %v3601_v2  ;;  %2121 = vmatpush1.bf16.msra.mxu0 %v2092_v47 }
 0x2e7   : >> { %2225 = vmatpush1.bf16.msra.mxu1 %v2200_v63  ;;  %v2199_v19 = vsel %vm5291_vm13, %v2193_v16, %v5288_v4  ;;  %2050 = vmatprep.mubr.bf16.mxu1 %v5282_v53 }
 0x2e8   : >> { %3397 = vmatmul.mubr.msk.bf16.gmra.mxu0 %vm385_vm8, %v3602_v5  ;;  %2226 = vmatprep.subr.bf16.mxu1 %v2199_v19  ;;  %v2191_v22 = vpop.permute.xlu1 %2190 }
 0x2e9   : >> { %v2198_v7 = vsel %vm5292_vm9, %v2191_v22, %v2193_v16  ;;  %2138 = vmatprep.mubr.bf16.mxu0 %v5282_v53 }
 0x2eb   : >> { %2227 = vmatpush1.bf16.msra.mxu1 %v2198_v7 }
 0x2ee   : >> { %3401 = vmatmul.mubr.msk.bf16.gmra.mxu1 %vm385_vm8, %v3603_v41 }
 0x2ef   : >> { %2244 = vmatprep.mubr.bf16.mxu1 %v5282_v53 }
 0x2f0   : >> { %3404 = vmatmul.mubr.msk.bf16.vlgmr.msra.gmra.mxu0 %vm385_vm8, %v3604_v1 }
 0x2f1   : >> { %2148 = vmatprep.mubr.bf16.mxu0 %v5282_v53 }
 0x2f6   : >> { %3408 = vmatmul.mubr.msk.bf16.vlgmr.msra.gmra.mxu1 %vm385_vm8, %v3605_v48 }
 0x2f7   : >> { %2254 = vmatprep.mubr.bf16.mxu1 %v5282_v53 }
 0x2f8   : >> { %3405 = vmatmul.mubr.msk.bf16.gmra.mxu0 %vm385_vm8, %v3606_v54 }
 0x2f9   : >> { %2369 = vmatprep.mubr.bf16.mxu0 %v5282_v53 }
 0x2fe   : >> { %3409 = vmatmul.mubr.msk.bf16.gmra.mxu1 %vm385_vm8, %v3607_v31 }
 0x2ff   : >> { %2467 = vmatprep.mubr.bf16.mxu1 %v5282_v53 }
 0x376   : >> { %v4604_v44 = vpop.f32.mrf.mxu1 }
 0x378   : >> { %v4606_v39 = vpop.f32.mrf.mxu1 }
 0x37a   : >> { %v1438_v26 = vpop.f32.mrf.mxu1 }
 0x37b   : >> { %v1455_v38 = vadd.f32 %v3368_v10, %v1438_v26  ;;  %v1454_v10 = vadd.f32 %v3367_v3, %v4606_v39 }
 0x37c   : >> { %v4608_v0 = vpop.f32.mrf.mxu1 }
 0x37e   : >> { %v1444_v61 = vpop.f32.mrf.mxu1 }
 0x37f   : >> { %v1457_v29 = vadd.f32 %v3370_v17, %v1444_v61 }
 0x380   : >> { %v4610_v62 = vpop.f32.mrf.mxu1  ;;  %v4612_v56 = vpop.f32.mrf.mxu0 }
 0x382   : >> { %v4614_v28 = vpop.f32.mrf.mxu1  ;;  %v4616_v14 = vpop.f32.mrf.mxu0 }
 0x384   : >> { %v4618_v27 = vpop.f32.mrf.mxu1  ;;  %v1540_v30 = vpop.f32.mrf.mxu0 }
 0x386   : >> { %v4620_v8 = vpop.f32.mrf.mxu0  ;;  %v4622_v32 = vpop.f32.mrf.mxu1 }
 0x388   : >> { %v1546_v35 = vpop.f32.mrf.mxu0  ;;  %v4624_v12 = vpop.f32.mrf.mxu1 }
 0x38a   : >> { %v4626_v36 = vpop.f32.mrf.mxu0  ;;  %v4628_v21 = vpop.f32.mrf.mxu1 }
 0x38c   : >> { %v4630_v37 = vpop.f32.mrf.mxu0  ;;  %v4632_v46 = vpop.f32.mrf.mxu1 }
 0x38e   : >> { %v4634_v49 = vpop.f32.mrf.mxu0  ;;  %v1652_v45 = vpop.f32.mrf.mxu1 }
 0x390   : >> { %v4636_v52 = vpop.f32.mrf.mxu1  ;;  %v4638_v40 = vpop.f32.mrf.mxu0 }
 0x392   : >> { %v4640_v42 = vpop.f32.mrf.mxu1  ;;  %v4642_v57 = vpop.f32.mrf.mxu0 }
 0x394   : >> { %v4644_v60 = vpop.f32.mrf.mxu1  ;;  %v4646_v33 = vpop.f32.mrf.mxu0 }
 0x396   : >> { %v4648_v59 = vpop.f32.mrf.mxu0  ;;  %v4650_v2 = vpop.f32.mrf.mxu1 }
 0x398   : >> { %v4652_v18 = vpop.f32.mrf.mxu0  ;;  %v4654_v9 = vpop.f32.mrf.mxu1 }
 0x39a   : >> { %v4656_v5 = vpop.f32.mrf.mxu0  ;;  %v4658_v47 = vpop.f32.mrf.mxu1 }
 0x39c   : >> { %v4660_v63 = vpop.f32.mrf.mxu0  ;;  %v4662_v16 = vpop.f32.mrf.mxu1 }
 0x39e   : >> { %v4664_v19 = vpop.f32.mrf.mxu0  ;;  %v4666_v22 = vpop.f32.mrf.mxu1 }
 0x3a0   : >> { %v4668_v7 = vpop.f32.mrf.mxu1  ;;  %v4670_v41 = vpop.f32.mrf.mxu0 }
 0x3a2   : >> { %v4672_v1 = vpop.f32.mrf.mxu1  ;;  %v4674_v48 = vpop.f32.mrf.mxu0 }
 0x3a3   : >> { %5293 = vst [vmem:[#allocation35_spill] sm:$0xff] %v4674_v48 }
 0x3a4   : >> { %v4676_v54 = vpop.f32.mrf.mxu1  ;;  %v4678_v31 = vpop.f32.mrf.mxu0 }
 0x3a6   : >> { %v4680_v4 = vpop.f32.mrf.mxu0  ;;  %v4682_v55 = vpop.f32.mrf.mxu1 }
 0x3a7   : >> { %5294 = vst [vmem:[#allocation36_spill] sm:$0xff] %v4682_v55 }
 0x3a8   : >> { %v4684_v24 = vpop.f32.mrf.mxu0  ;;  %v4686_v23 = vpop.f32.mrf.mxu1 }
 0x3a9   : >> { %5295 = vst [vmem:[#allocation31_spill] sm:$0xff] %v4686_v23  ;;  %v3373_v23 = vld [vmem:[%s5094_s2 + $0x78] sm:$0xff] }
 0x3aa   : >> { %v4688_v20 = vpop.f32.mrf.mxu0  ;;  %v4690_v51 = vpop.f32.mrf.mxu1  ;;  %v1460_v26 = vadd.f32 %v3373_v23, %v4618_v27 }
 0x3ac   : >> { %v4692_v53 = vpop.f32.mrf.mxu0  ;;  %v4694_v43 = vpop.f32.mrf.mxu1 }
 0x3ad   : >> { %5296 = vst [vmem:[#allocation32_spill] sm:$0xff] %v4692_v53  ;;  %5297 = vst [vmem:[#allocation34_spill] sm:$0xff] %v4694_v43  ;;  %v1456_v43 = vadd.f32 %v3369_v6, %v4608_v0  ;;  %v1559_v53 = vadd.f32 %v1546_v35, %v1457_v29 }
 0x3ae   : >> { %v4702_v34 = vpop.f32.mrf.mxu0  ;;  %v4704_v25 = vpop.f32.mrf.mxu1 }
 0x3af   : >> { %5298 = vst [vmem:[#allocation37_spill] sm:$0xff] %v4702_v34  ;;  %5299 = vst [vmem:[#allocation38_spill] sm:$0xff] %v4704_v25  ;;  %v1453_v34 = vadd.f32 %v3366_v50, %v4604_v44  ;;  %v1557_v25 = vadd.f32 %v1540_v30, %v1455_v38  ;;  %v1558_v61 = vadd.f32 %v4620_v8, %v1456_v43 }
 0x3b0   : >> { %v4718_v11 = vpop.f32.mrf.mxu1  ;;  %v4720_v58 = vpop.f32.mrf.mxu0  ;;  %v1556_v38 = vadd.f32 %v4616_v14, %v1454_v10 }
 0x3b1   : >> { %5300 = vst [vmem:[#allocation39_spill] sm:$0xff] %v4718_v11  ;;  %5301 = vst [vmem:[#allocation33_spill] sm:$0xff] %v4720_v58  ;;  %v1458_v11 = vadd.f32 %v3371_v15, %v4610_v62  ;;  %v1459_v58 = vadd.f32 %v3372_v13, %v4614_v28  ;;  %v1555_v17 = vadd.f32 %v4612_v56, %v1453_v34 }
 0x3b2   : >> { %v2056_v55 = vpop.f32.mrf.mxu1  ;;  %v4730_v48 = vpop.f32.mrf.mxu0  ;;  %v1663_v0 = vadd.f32 %v4628_v21, %v1557_v25  ;;  %v1665_v62 = vadd.f32 %v1652_v45, %v1559_v53  ;;  %v1664_v3 = vadd.f32 %v4632_v46, %v1558_v61  ;;  %v1562_v13 = vadd.f32 %v4634_v49, %v1460_v26 }
 0x3b3   : >> { %v1560_v6 = vadd.f32 %v4626_v36, %v1458_v11  ;;  %v1561_v15 = vadd.f32 %v4630_v37, %v1459_v58  ;;  %v1661_v29 = vadd.f32 %v4622_v32, %v1555_v17  ;;  %v1662_v58 = vadd.f32 %v4624_v12, %v1556_v38 }
 0x3b4   : >> { %v2058_v50 = vpop.f32.mrf.mxu1  ;;  %v2144_v44 = vpop.f32.mrf.mxu0  ;;  %v1769_v11 = vadd.f32 %v4646_v33, %v1663_v0  ;;  %v1771_v25 = vadd.f32 %v4652_v18, %v1665_v62  ;;  %v1668_v56 = vadd.f32 %v4644_v60, %v1562_v13  ;;  %v1770_v28 = vadd.f32 %v4648_v59, %v1664_v3  ;;  %v5309_v0 = vld [vmem:[#allocation31_spill] sm:$0xff] }
 0x3b5   : >> { %v1666_v43 = vadd.f32 %v4636_v52, %v1560_v6  ;;  %v1667_v39 = vadd.f32 %v4640_v42, %v1561_v15  ;;  %v1767_v53 = vadd.f32 %v4638_v40, %v1661_v29  ;;  %v1768_v36 = vadd.f32 %v4642_v57, %v1662_v58 }
 0x3b6   : >> { %v2146_v34 = vpop.f32.mrf.mxu0  ;;  %v2246_v23 = vpop.f32.mrf.mxu1  ;;  %v1851_v8 = vadd.f32 %v4658_v47, %v1769_v11  ;;  %v1853_v35 = vadd.f32 %v4666_v22, %v1771_v25  ;;  %v1852_v21 = vadd.f32 %v4662_v16, %v1770_v28  ;;  %v1774_v37 = vadd.f32 %v4664_v19, %v1668_v56  ;;  %v5303_v19 = vld [vmem:[#allocation38_spill] sm:$0xff]  ;;  %v5307_v10 = vld [vmem:[#allocation37_spill] sm:$0xff] }
 0x3b7   : >> { %v1772_v30 = vadd.f32 %v4656_v5, %v1666_v43  ;;  %v1773_v32 = vadd.f32 %v4660_v63, %v1667_v39  ;;  %v1849_v12 = vadd.f32 %v4650_v2, %v1767_v53  ;;  %v1850_v60 = vadd.f32 %v4654_v9, %v1768_v36  ;;  %v5302_v63 = vld [vmem:[#allocation32_spill] sm:$0xff] }
 0x3b8   : >> { %v2150_v14 = vpop.f32.mrf.mxu0  ;;  %v2248_v27 = vpop.f32.mrf.mxu1  ;;  %v1957_v40 = vadd.f32 %v4678_v31, %v1851_v8  ;;  %v1959_v42 = vadd.f32 %v4684_v24, %v1853_v35  ;;  %v1856_v33 = vadd.f32 %v4676_v54, %v1774_v37  ;;  %v1958_v59 = vadd.f32 %v4680_v4, %v1852_v21  ;;  %v5306_v31 = vld [vmem:[#allocation34_spill] sm:$0xff]  ;;  %v5308_v4 = vld [vmem:[#allocation39_spill] sm:$0xff]  ;;  %v5310_v15 = vld [vmem:[#allocation33_spill] sm:$0xff] }
 0x3b9   : >> { %v1854_v45 = vadd.f32 %v4668_v7, %v1772_v30  ;;  %v1855_v52 = vadd.f32 %v4672_v1, %v1773_v32  ;;  %v1955_v57 = vadd.f32 %v4670_v41, %v1849_v12  ;;  %v5304_v7 = vld [vmem:[#allocation35_spill] sm:$0xff]  ;;  %v5305_v1 = vld [vmem:[#allocation36_spill] sm:$0xff] }
 0x3ba   : >> { %v2152_v46 = vpop.f32.mrf.mxu0  ;;  %v2250_v49 = vpop.f32.mrf.mxu1  ;;  %v2063_v47 = vadd.f32 %v4690_v51, %v1957_v40  ;;  %v2065_v22 = vadd.f32 %v5303_v19, %v1959_v42  ;;  %v1956_v24 = vadd.f32 %v5304_v7, %v1850_v60  ;;  %v2064_v41 = vadd.f32 %v5306_v31, %v1958_v59  ;;  %v5313_v40 = vld [vmem:[#allocation11_spill] sm:$0xff]  ;;  %v5331_v31 = vld [vmem:[#allocation17_spill] sm:$0xff] }
 0x3bb   : >> { %v1960_v5 = vadd.f32 %v4688_v20, %v1854_v45  ;;  %v1961_v16 = vadd.f32 %v5302_v63, %v1855_v52  ;;  %v2061_v9 = vadd.f32 %v5305_v1, %v1955_v57  ;;  %v1962_v54 = vadd.f32 %v5307_v10, %v1856_v33  ;;  %v5311_v45 = vld [vmem:[#allocation13_spill] sm:$0xff]  ;;  %v5317_v33 = vld [vmem:[#allocation14_spill] sm:$0xff]  ;;  %v5323_v63 = vld [vmem:[#allocation16_spill] sm:$0xff] }
 0x3bc   : >> { %v2154_v2 = vpop.f32.mrf.mxu0  ;;  %v2252_v18 = vpop.f32.mrf.mxu1  ;;  %v2161_v6 = vadd.f32 %v2144_v44, %v2063_v47  ;;  %v2163_v20 = vadd.f32 %v2150_v14, %v2065_v22  ;;  %v2062_v51 = vadd.f32 %v5309_v0, %v1956_v24  ;;  %v2162_v29 = vadd.f32 %v2146_v34, %v2064_v41  ;;  %v5325_v19 = vld [vmem:[#allocation15_spill] sm:$0xff]  ;;  %v5341_v0 = vld [vmem:[#allocation21_spill] sm:$0xff] }
 0x3bd   : >> { %v2066_v26 = vadd.f32 %v5308_v4, %v1960_v5  ;;  %v2067_v61 = vadd.f32 %v2056_v55, %v1961_v16  ;;  %v2159_v62 = vadd.f32 %v5310_v15, %v2061_v9  ;;  %v2068_v38 = vadd.f32 %v2058_v50, %v1962_v54  ;;  %v5329_v1 = vld [vmem:[#allocation19_spill] sm:$0xff]  ;;  %v5334_v54 = vld [vmem:[#allocation18_spill] sm:$0xff]  ;;  %v5336_v4 = vld [vmem:[#allocation20_spill] sm:$0xff] }
 0x3be   : >> { %v2256_v17 = vpop.f32.mrf.mxu1  ;;  %v2156_v3 = vpop.f32.mrf.mxu0  ;;  %v2267_v39 = vadd.f32 %v2250_v49, %v2161_v6  ;;  %v2160_v58 = vadd.f32 %v4730_v48, %v2062_v51  ;;  %v2268_v28 = vadd.f32 %v2252_v18, %v2162_v29  ;;  %vm5312_vm11 = vcmp.ne.s16.totalorder %v5311_v45, 0  ;;  %v5343_v15 = vld [vmem:[#allocation22_spill] sm:$0xff] }
 0x3bf   : >> { %v2164_v43 = vadd.f32 %v2152_v46, %v2066_v26  ;;  %v2165_v11 = vadd.f32 %v2154_v2, %v2067_v61  ;;  %v2269_v25 = vadd.f32 %v2256_v17, %v2163_v20  ;;  %v2265_v53 = vadd.f32 %v2246_v23, %v2159_v62  ;;  %vm5315_vm7 = vmmov %vm5312_vm11  ;;  %v5319_v2 = vld [vmem:[#allocation12_spill] sm:$0xff] }
 0x3c0   : >> { %v2258_v13 = vpop.f32.mrf.mxu1  ;;  %v2166_v55 = vadd.f32 %v2156_v3, %v2068_v38  ;;  %v2266_v30 = vadd.f32 %v2248_v27, %v2160_v58  ;;  %v2275_v32 = vmax.f32 %v2267_v39, 0.0  ;;  %v2276_v12 = vmax.f32 %v2268_v28, 0.0  ;;  %v5348_v39 = vld [vmem:[#allocation23_spill] sm:$0xff] }
 0x3c1   : >> { %v2270_v44 = vadd.f32 %v2258_v13, %v2164_v43  ;;  %v2277_v35 = vmax.f32 %v2269_v25, 0.0  ;;  %v2273_v36 = vmax.f32 %v2265_v53, 0.0  ;;  %vm5314_vm10 = vcmp.ne.s16.totalorder %v5313_v40, 0 }
 0x3c2   : >> { %v2260_v56 = vpop.f32.mrf.mxu1  ;;  %v2274_v49 = vmax.f32 %v2266_v30, 0.0  ;;  %vm5316_vm13 = vmmov %vm5314_vm10  ;;  %vm5318_vm9 = vcmp.ne.s16.totalorder %v5317_v33, 0  ;;  %v5352_v30 = vld [vmem:[#allocation24_spill] sm:$0xff] }
 0x3c3   : >> { %v2271_v14 = vadd.f32 %v2260_v56, %v2165_v11  ;;  %v2278_v21 = vmax.f32 %v2270_v44, 0.0  ;;  %v4783_v48 = vpack.c.bf16 %v2275_v32, %v2273_v36  ;;  %v3609_v36 = vld [vmem:[#allocation2 + $0x128] sm:$0xff]  }
 0x3c4   : >> { %v2262_v8 = vpop.f32.mrf.mxu1  ;;  %v4791_v52 = vpack.c.bf16 %v2276_v12, %v2274_v49  ;;  %v3610_v49 = vld [vmem:[#allocation2 + $0x130] sm:$0xff]  }
 0x3c5   : >> { %v2279_v50 = vmax.f32 %v2271_v14, 0.0  ;;  %v2272_v34 = vadd.f32 %v2262_v8, %v2166_v55  ;;  %v2292_v60 = vsel %vm5315_vm7, %v4783_v48, 0  ;;  %v3608_v55 = vld [vmem:[#allocation2 + $0x120] sm:$0xff]  }
 0x3c6   : >> { %v2293_v57 = vsel %vm5316_vm13, %v4791_v52, 0  ;;  %vm5324_vm13 = vcmp.ne.s16.totalorder %v5323_v63, 0  ;;  %v5355_v63 = vld [vmem:[#allocation26_spill] sm:$0xff] }
 0x3c7   : >> { %v4781_v37 = vpack.c.bf16 %v2279_v50, %v2277_v35  ;;  %v2280_v46 = vmax.f32 %v2272_v34, 0.0  ;;  %v5353_v35 = vmov 0  }
 0x3c9   : >> { %v4785_v23 = vpack.c.bf16 %v2280_v46, %v2278_v21  ;;  %v2294_v27 = vsel %vm5312_vm11, %v4781_v37, 0  ;;  %v2494_v59 = vsel %vm5318_vm9, %v4781_v37, 0  ;;  %vm5320_vm11 = vcmp.ne.s16.totalorder %v5319_v2, 0  ;;  %v3611_v2 = vld [vmem:[#allocation2 + $0x140] sm:$0xff]  }
 0x3ca   : >> { %2319 = vrot.lane.b32.xlu0 %v2294_v27, %s3746_s9  ;;  %vm5322_vm7 = vmmov %vm5320_vm11  ;;  %v2596_v16 = vsel %vm5324_vm13, %v4781_v37, 0  ;;  %v5354_v27 = vld [vmem:[#allocation25_spill] sm:$0xff] }
 0x3cb   : >> { %v2295_v42 = vsel %vm5314_vm10, %v4785_v23, 0  ;;  %v2495_v18 = vsel %vm5320_vm11, %v4785_v23, 0  ;;  %vm5321_vm10 = vmmov %vm5318_vm9  ;;  %v2493_v47 = vsel %vm5322_vm7, %v4791_v52, 0  ;;  %vm5326_vm9 = vcmp.ne.s16.totalorder %v5325_v19, 0 }
 0x3cc   : >> { %2321 = vrot.lane.b32.xlu1 %v2295_v42, %s3746_s9  ;;  %v2492_v5 = vsel %vm5321_vm10, %v4783_v48, 0  ;;  %v2597_v22 = vsel %vm5326_vm9, %v4785_v23, 0  ;;  %vm5327_vm11 = vmmov %vm5324_vm13  ;;  %vm5330_vm7 = vcmp.ne.s16.totalorder %v5329_v1, 0  ;;  %vm5332_vm13 = vcmp.ne.s16.totalorder %v5331_v31, 0  ;;  %v3613_v1 = vld [vmem:[#allocation2 + $0x148] sm:$0xff]  }
 0x3cd   : >> { %v2594_v7 = vsel %vm5327_vm11, %v4783_v48, 0  ;;  %vm5328_vm10 = vmmov %vm5326_vm9  ;;  %v2775_v9 = vsel %vm5330_vm7, %v4791_v52, 0  ;;  %v2776_v41 = vsel %vm5332_vm13, %v4781_v37, 0  ;;  %vm5335_vm11 = vcmp.ne.s16.totalorder %v5334_v54, 0 }
 0x3ce   : >> { %2315 = vrot.lane.b32.xlu0 %v2292_v60, %s3746_s9  ;;  %v2595_v24 = vsel %vm5328_vm10, %v4791_v52, 0  ;;  %vm5333_vm9 = vmmov %vm5330_vm7  ;;  %v2878_v17 = vsel %vm5335_vm11, %v4781_v37, 0  ;;  %vm5337_vm10 = vcmp.ne.s16.totalorder %v5336_v4, 0  ;;  %v3615_v4 = vld [vmem:[#allocation2 + $0x160] sm:$0xff]  }
 0x3cf   : >> { %v2777_v10 = vsel %vm5333_vm9, %v4785_v23, 0  ;;  %v2879_v26 = vsel %vm5337_vm10, %v4785_v23, 0  ;;  %vm5338_vm7 = vmmov %vm5332_vm13 }
 0x3d0   : >> { %2317 = vrot.lane.b32.xlu1 %v2293_v57, %s3746_s9  ;;  %v2774_v61 = vsel %vm5338_vm7, %v4783_v48, 0  ;;  %vm5339_vm13 = vmmov %vm5337_vm10  ;;  %vm5344_vm10 = vcmp.ne.s16.totalorder %v5343_v15, 0 }
 0x3d1   : >> { %v2877_v6 = vsel %vm5339_vm13, %v4791_v52, 0  ;;  %vm5340_vm9 = vmmov %vm5335_vm11  ;;  %vm5342_vm11 = vcmp.ne.s16.totalorder %v5341_v0, 0  ;;  %v3075_v62 = vsel %vm5344_vm10, %v4785_v23, 0 }
 0x3d2   : >> { %2417 = vrot.lane.b32.xlu0 %v4781_v37, %s3747_s10  ;;  %v2876_v20 = vsel %vm5340_vm9, %v4783_v48, 0  ;;  %v3074_v51 = vsel %vm5342_vm11, %v4781_v37, 0  ;;  %vm5345_vm7 = vmmov %vm5344_vm10  ;;  %vm5347_vm9 = vcmask 138240  }
 0x3d3   : >> { %v3073_v38 = vsel %vm5345_vm7, %v4791_v52, 0  ;;  %vm5346_vm13 = vmmov %vm5342_vm11 }
 0x3d4   : >> { %2419 = vrot.lane.b32.xlu1 %v4785_v23, %s3747_s10  ;;  %v3072_v29 = vsel %vm5346_vm13, %v4783_v48, 0  ;;  %vm5349_vm11 = vmmov %vm5347_vm9 }
 0x3d5   : >> { %vm5350_vm10 = vmmov %vm5347_vm9 }
 0x3d6   : >> { %2519 = vrot.lane.b32.xlu0 %v2494_v59, %s3745_s8  ;;  %vm5351_vm7 = vmmov %vm5347_vm9 }
 0x3d8   : >> { %2415 = vrot.lane.b32.xlu1 %v4791_v52, %s3747_s10 }
 0x3da   : >> { %2413 = vrot.lane.b32.xlu0 %v4783_v48, %s3747_s10 }
 0x3dc   : >> { %2521 = vrot.lane.b32.xlu1 %v2495_v18, %s3745_s8 }
 0x3de   : >> { %2515 = vrot.lane.b32.xlu0 %v2492_v5, %s3745_s8  ;;  %v3612_v5 = vld [vmem:[#allocation2 + $0x138] sm:$0xff]  }
 0x3e0   : >> { %2517 = vrot.lane.b32.xlu1 %v2493_v47, %s3745_s8 }
 0x3e2   : >> { %2621 = vrot.lane.b32.xlu0 %v2596_v16, %s3744_s7 }
 0x3e4   : >> { %2623 = vrot.lane.b32.xlu1 %v2597_v22, %s3744_s7 }
 0x3e6   : >> { %2617 = vrot.lane.b32.xlu0 %v2594_v7, %s3744_s7 }
 0x3e8   : >> { %2619 = vrot.lane.b32.xlu1 %v2595_v24, %s3744_s7 }
 0x3ea   : >> { %2799 = vrot.lane.b32.xlu0 %v2775_v9, %s3743_s6  ;;  %v3614_v9 = vld [vmem:[#allocation2 + $0x150] sm:$0xff]  }
 0x3ec   : >> { %2801 = vrot.lane.b32.xlu1 %v2776_v41, %s3743_s6  ;;  %v5356_v41 = vld [vmem:[#allocation27_spill] sm:$0xff] }
 0x3ee   : >> { %2803 = vrot.lane.b32.xlu0 %v2777_v10, %s3743_s6 }
 0x3f0   : >> { %2903 = vrot.lane.b32.xlu1 %v2878_v17, %s3742_s5 }
 0x3f2   : >> { %2905 = vrot.lane.b32.xlu0 %v2879_v26, %s3742_s5  ;;  %v5357_v26 = vld [vmem:[#allocation28_spill] sm:$0xff] }
 0x3f4   : >> { %2797 = vrot.lane.b32.xlu1 %v2774_v61, %s3743_s6 }
 0x3f6   : >> { %2901 = vrot.lane.b32.xlu0 %v2877_v6, %s3742_s5 }
 0x3f8   : >> { %2899 = vrot.lane.b32.xlu1 %v2876_v20, %s3742_s5  ;;  %v3616_v20 = vld [vmem:[#allocation2 + $0x158] sm:$0xff]  }
 0x3fa   : >> { %2999 = vrot.lane.b32.xlu0 %v4785_v23, %s3748_s21 }
 0x3fc   : >> { %2997 = vrot.lane.b32.xlu1 %v4781_v37, %s3748_s21 }
 0x3fe   : >> { %2995 = vrot.lane.b32.xlu0 %v4791_v52, %s3748_s21 }
 0x400   : >> { %3099 = vrot.lane.b32.xlu1 %v3074_v51, %s3741_s4 }
 0x402   : >> { %3101 = vrot.lane.b32.xlu0 %v3075_v62, %s3741_s4 }
 0x404   : >> { %2993 = vrot.lane.b32.xlu1 %v4783_v48, %s3748_s21 }
 0x406   : >> { %3097 = vrot.lane.b32.xlu0 %v3073_v38, %s3741_s4 }
 0x408   : >> { %3095 = vrot.lane.b32.xlu1 %v3072_v29, %s3741_s4 }
 0x43c   : >> { %v2320_v3 = vpop.permute.xlu0 %2319 }
 0x43d   : >> { %v2325_v11 = vsel %vm5349_vm11, %v5348_v39, %v2320_v3 }
 0x43e   : >> { %v2322_v13 = vpop.permute.xlu1 %2321 }
 0x43f   : >> { %v2326_v43 = vsel %vm5347_vm9, %v2320_v3, %v2322_v13  ;;  %v3617_v13 = vld [vmem:[#allocation2 + $0x168] sm:$0xff]   ;;  %vm5372_vm9 = vcmask 1040384  }
 0x440   : >> { %v2316_v25 = vpop.permute.xlu0 %2315  ;;  %2349 = vmatprep.subr.bf16.mxu0 %v2326_v43  ;;  %v5358_v43 = vld [vmem:[#allocation29_spill] sm:$0xff]  ;;  %vm5373_vm11 = vmmov %vm5372_vm9 }
 0x441   : >> { %2350 = vmatpush1.bf16.msra.mxu0 %v2325_v11  ;;  %v2323_v56 = vsel %vm5351_vm7, %v5348_v39, %v2316_v25 }
 0x442   : >> { %v2318_v58 = vpop.permute.xlu1 %2317 }
 0x443   : >> { %v2324_v53 = vsel %vm5350_vm10, %v2316_v25, %v2318_v58  ;;  %v3618_v25 = vld [vmem:[#allocation2 + $0x170] sm:$0xff]  }
 0x444   : >> { %v2418_v28 = vpop.permute.xlu0 %2417  ;;  %2351 = vmatprep.subr.bf16.mxu0 %v2324_v53 }
 0x445   : >> { %2352 = vmatpush1.bf16.msra.mxu0 %v2323_v56  ;;  %v2423_v8 = vsel %vm482_vm15, %v5352_v30, %v2418_v28 }
 0x446   : >> { %v2420_v44 = vpop.permute.xlu1 %2419 }
 0x447   : >> { %v2424_v14 = vsel %vm482_vm15, %v2418_v28, %v2420_v44  ;;  %v3619_v44 = vld [vmem:[#allocation2 + $0x180] sm:$0xff]  }
 0x448   : >> { %v2520_v32 = vpop.permute.xlu0 %2519  ;;  %3418 = vmatmul.mubr.msk.bf16.vlgmr.msra.gmra.mxu0 %vm385_vm8, %v3608_v55  ;;  %2447 = vmatprep.subr.bf16.mxu1 %v2424_v14  ;;  %v5359_v14 = vld [vmem:[#allocation30_spill] sm:$0xff] }
 0x449   : >> { %2448 = vmatpush1.bf16.msra.mxu1 %v2423_v8  ;;  %2379 = vmatprep.mubr.bf16.mxu0 %v5353_v35  ;;  %v2525_v40 = vsel %vm613_vm12, %v5354_v27, %v2520_v32 }
 0x44a   : >> { %v2416_v50 = vpop.permute.xlu1 %2415 }
 0x44c   : >> { %v2414_v34 = vpop.permute.xlu0 %2413 }
 0x44d   : >> { %v2421_v12 = vsel %vm482_vm15, %v5352_v30, %v2414_v34  ;;  %v2422_v21 = vsel %vm482_vm15, %v2414_v34, %v2416_v50 }
 0x44e   : >> { %2449 = vmatprep.subr.bf16.mxu1 %v2422_v21  ;;  %v2522_v46 = vpop.permute.xlu1 %2521 }
 0x44f   : >> { %2450 = vmatpush1.bf16.msra.mxu1 %v2421_v12  ;;  %v2526_v45 = vsel %vm613_vm12, %v2520_v32, %v2522_v46  ;;  %v3620_v32 = vld [vmem:[#allocation2 + $0x178] sm:$0xff]  }
 0x450   : >> { %v2516_v42 = vpop.permute.xlu0 %2515  ;;  %3419 = vmatmul.mubr.msk.bf16.gmra.mxu0 %vm385_vm8, %v3609_v36  ;;  %2549 = vmatprep.subr.bf16.mxu0 %v2526_v45  ;;  %v3622_v45 = vld [vmem:[#allocation2 + $0x190] sm:$0xff]  }
 0x451   : >> { %2550 = vmatpush1.bf16.msra.mxu0 %v2525_v40  ;;  %2569 = vmatprep.mubr.bf16.mxu0 %v5353_v35  ;;  %v2523_v33 = vsel %vm613_vm12, %v5354_v27, %v2516_v42  ;;  %v3623_v27 = vld [vmem:[#allocation2 + $0x1a0] sm:$0xff]   ;;  %v3624_v40 = vld [vmem:[#allocation2 + $0x198] sm:$0xff]  }
 0x452   : >> { %3422 = vmatmul.mubr.msk.bf16.vlgmr.msra.gmra.mxu1 %vm385_vm8, %v3610_v49  ;;  %v2518_v60 = vpop.permute.xlu1 %2517  ;;  %v3621_v49 = vld [vmem:[#allocation2 + $0x188] sm:$0xff]  }
 0x453   : >> { %v2524_v57 = vsel %vm613_vm12, %v2516_v42, %v2518_v60  ;;  %2477 = vmatprep.mubr.bf16.mxu1 %v5353_v35  ;;  %vm5360_vm12 = vcmask 908288   ;;  %v3625_v42 = vld [vmem:[#allocation2 + $0x1a8] sm:$0xff]  }
 0x454   : >> { %v2622_v59 = vpop.permute.xlu0 %2621  ;;  %2551 = vmatprep.subr.bf16.mxu0 %v2524_v57  ;;  %vm5362_vm15 = vmmov %vm5360_vm12 }
 0x455   : >> { %2552 = vmatpush1.bf16.msra.mxu0 %v2523_v33  ;;  %v2627_v16 = vsel %vm730_vm4, %v5355_v63, %v2622_v59 }
 0x456   : >> { %2729 = vmatprep.subr.bf16.mxu0 %v4785_v23  ;;  %v2624_v18 = vpop.permute.xlu1 %2623 }
 0x457   : >> { %v2628_v47 = vsel %vm730_vm4, %v2622_v59, %v2624_v18 }
 0x458   : >> { %v2618_v19 = vpop.permute.xlu0 %2617  ;;  %3426 = vmatmul.mubr.msk.bf16.vlgmr.msra.gmra.mxu0 %vm385_vm8, %v3611_v2  ;;  %2651 = vmatprep.subr.bf16.mxu1 %v2628_v47 }
 0x459   : >> { %2652 = vmatpush1.bf16.msra.mxu1 %v2627_v16  ;;  %2730 = vmatpush1.bf16.msra.mxu0 %v4781_v37  ;;  %v2625_v7 = vsel %vm730_vm4, %v5355_v63, %v2618_v19 }
 0x45a   : >> { %3423 = vmatmul.mubr.msk.bf16.gmra.mxu1 %vm385_vm8, %v3612_v5  ;;  %2731 = vmatprep.subr.bf16.mxu0 %v4791_v52  ;;  %v2620_v22 = vpop.permute.xlu1 %2619 }
 0x45b   : >> { %v2626_v23 = vsel %vm730_vm4, %v2618_v19, %v2620_v22  ;;  %2579 = vmatprep.mubr.bf16.mxu0 %v5353_v35  ;;  %2671 = vmatprep.mubr.bf16.mxu1 %v5353_v35  ;;  %vm5363_vm4 = vmmov %vm5360_vm12 }
 0x45c   : >> { %v2800_v24 = vpop.permute.xlu0 %2799  ;;  %2653 = vmatprep.subr.bf16.mxu1 %v2626_v23 }
 0x45d   : >> { %2654 = vmatpush1.bf16.msra.mxu1 %v2625_v7  ;;  %2732 = vmatpush1.bf16.msra.mxu0 %v4783_v48  ;;  %v2806_v48 = vsel %vm693_vm5, %v2800_v24, %v5356_v41 }
 0x45e   : >> { %v2802_v37 = vpop.permute.xlu1 %2801 }
 0x460   : >> { %v2804_v31 = vpop.permute.xlu0 %2803  ;;  %3427 = vmatmul.mubr.msk.bf16.gmra.mxu0 %vm385_vm8, %v3613_v1 }
 0x461   : >> { %v2807_v52 = vsel %vm693_vm5, %v2802_v37, %v2804_v31  ;;  %v2808_v10 = vsel %vm693_vm5, %v2804_v31, %v5356_v41  ;;  %2749 = vmatprep.mubr.bf16.mxu0 %v5353_v35 }
 0x462   : >> { %3430 = vmatmul.mubr.msk.bf16.vlgmr.msra.gmra.mxu1 %vm385_vm8, %v3614_v9  ;;  %2831 = vmatprep.subr.bf16.mxu1 %v2808_v10  ;;  %v2904_v54 = vpop.permute.xlu1 %2903 }
 0x463   : >> { %2832 = vmatpush1.bf16.msra.mxu1 %v2807_v52  ;;  %2681 = vmatprep.mubr.bf16.mxu1 %v5353_v35 }
 0x464   : >> { %v2906_v17 = vpop.permute.xlu0 %2905  ;;  %2833 = vmatprep.subr.bf16.mxu1 %v2806_v48 }
 0x465   : >> { %v2910_v61 = vsel %vm576_vm14, %v2906_v17, %v5357_v26  ;;  %v2909_v51 = vsel %vm576_vm14, %v2904_v54, %v2906_v17 }
 0x466   : >> { %2933 = vmatprep.subr.bf16.mxu0 %v2910_v61  ;;  %v2798_v6 = vpop.permute.xlu1 %2797 }
 0x467   : >> { %v2805_v0 = vsel %vm693_vm5, %v2798_v6, %v2800_v24 }
 0x468   : >> { %v2902_v15 = vpop.permute.xlu0 %2901  ;;  %3434 = vmatmul.mubr.msk.bf16.vlgmr.msra.gmra.mxu0 %vm385_vm8, %v3615_v4  ;;  %2834 = vmatpush1.bf16.msra.mxu1 %v2805_v0 }
 0x469   : >> { %2934 = vmatpush1.bf16.msra.mxu0 %v2909_v51  ;;  %v2908_v62 = vsel %vm576_vm14, %v2902_v15, %v5357_v26  ;;  %2759 = vmatprep.mubr.bf16.mxu0 %v5353_v35 }
 0x46a   : >> { %3431 = vmatmul.mubr.msk.bf16.gmra.mxu1 %vm385_vm8, %v3616_v20  ;;  %2935 = vmatprep.subr.bf16.mxu0 %v2908_v62  ;;  %v2900_v38 = vpop.permute.xlu1 %2899 }
 0x46b   : >> { %v2907_v29 = vsel %vm576_vm14, %v2900_v38, %v2902_v15  ;;  %2851 = vmatprep.mubr.bf16.mxu1 %v5353_v35  ;;  %vm5361_vm14 = vmmov %vm5360_vm12 }
 0x46c   : >> { %v3000_v3 = vpop.permute.xlu0 %2999 }
 0x46d   : >> { %2936 = vmatpush1.bf16.msra.mxu0 %v2907_v29  ;;  %v3004_v39 = vsel %vm1143_vm6, %v3000_v3, %v5358_v43 }
 0x46e   : >> { %3027 = vmatprep.subr.bf16.mxu1 %v3004_v39  ;;  %v2998_v11 = vpop.permute.xlu1 %2997 }
 0x46f   : >> { %v3003_v56 = vsel %vm1143_vm6, %v2998_v11, %v3000_v3  ;;  %v3410_v11 = vld [vmem:[%s5094_s2 + $0x80] sm:$0xff] }
 0x470   : >> { %v2996_v58 = vpop.permute.xlu0 %2995  ;;  %3435 = vmatmul.mubr.msk.bf16.gmra.mxu0 %vm385_vm8, %v3617_v13 }
 0x471   : >> { %v3002_v53 = vsel %vm1143_vm6, %v2996_v58, %v5358_v43  ;;  %2953 = vmatprep.mubr.bf16.mxu0 %v5353_v35 }
 0x472   : >> { %3438 = vmatmul.mubr.msk.bf16.vlgmr.msra.gmra.mxu1 %vm385_vm8, %v3618_v25  ;;  %v3100_v28 = vpop.permute.xlu1 %3099 }
 0x473   : >> { %3028 = vmatpush1.bf16.msra.mxu1 %v3003_v56  ;;  %2861 = vmatprep.mubr.bf16.mxu1 %v5353_v35 }
 0x474   : >> { %3029 = vmatprep.subr.bf16.mxu1 %v3002_v53  ;;  %v3102_v55 = vpop.permute.xlu0 %3101  ;;  %v3411_v53 = vld [vmem:[%s5094_s2 + $0x88] sm:$0xff] }
 0x475   : >> { %v3106_v30 = vsel %vm5360_vm12, %v3102_v55, %v5359_v14  ;;  %v3105_v34 = vsel %vm5361_vm14, %v3100_v28, %v3102_v55 }
 0x476   : >> { %3129 = vmatprep.subr.bf16.mxu0 %v3106_v30  ;;  %v2994_v8 = vpop.permute.xlu1 %2993 }
 0x477   : >> { %v3001_v50 = vsel %vm1143_vm6, %v2994_v8, %v2996_v58  ;;  %vm5370_vm6 = vcmask 1045504  }
 0x478   : >> { %v3098_v36 = vpop.permute.xlu0 %3097  ;;  %3442 = vmatmul.mubr.msk.bf16.vlgmr.msra.gmra.mxu0 %vm385_vm8, %v3619_v44  ;;  %3030 = vmatpush1.bf16.msra.mxu1 %v3001_v50  ;;  %v3412_v44 = vld [vmem:[%s5094_s2 + $0x90] sm:$0xff]  ;;  %v3413_v50 = vld [vmem:[%s5094_s2 + $0x98] sm:$0xff]  ;;  %vm5371_vm13 = vmmov %vm5370_vm6 }
 0x479   : >> { %3130 = vmatpush1.bf16.msra.mxu0 %v3105_v34  ;;  %v3104_v12 = vsel %vm5362_vm15, %v3098_v36, %v5359_v14  ;;  %2963 = vmatprep.mubr.bf16.mxu0 %v5353_v35 }
 0x47a   : >> { %3439 = vmatmul.mubr.msk.bf16.gmra.mxu1 %vm385_vm8, %v3620_v32  ;;  %3131 = vmatprep.subr.bf16.mxu0 %v3104_v12  ;;  %v3096_v21 = vpop.permute.xlu1 %3095 }
 0x47b   : >> { %v3103_v46 = vsel %vm5363_vm4, %v3096_v21, %v3098_v36  ;;  %3047 = vmatprep.mubr.bf16.mxu1 %v5353_v35  ;;  %v3414_v21 = vld [vmem:[%s5094_s2 + $0xa0] sm:$0xff] }
 0x47d   : >> { %3132 = vmatpush1.bf16.msra.mxu0 %v3103_v46 }
 0x480   : >> { %3443 = vmatmul.mubr.msk.bf16.gmra.mxu0 %vm385_vm8, %v3621_v49 }
 0x481   : >> { %3149 = vmatprep.mubr.bf16.mxu0 %v5353_v35 }
 0x482   : >> { %3446 = vmatmul.mubr.msk.bf16.vlgmr.msra.gmra.mxu1 %vm385_vm8, %v3622_v45 }
 0x483   : >> { %3057 = vmatprep.mubr.bf16.mxu1 %v5353_v35 }
 0x488   : >> { %3450 = vmatmul.mubr.msk.bf16.vlgmr.msra.gmra.mxu0 %vm385_vm8, %v3623_v27 }
 0x489   : >> { %3159 = vmatprep.mubr.bf16.mxu0 %v5353_v35 }
 0x48a   : >> { %3447 = vmatmul.mubr.msk.bf16.gmra.mxu1 %vm385_vm8, %v3624_v40 }
 0x490   : >> { %3451 = vmatmul.mubr.msk.bf16.gmra.mxu0 %vm385_vm8, %v3625_v42  ;;  %v3415_v42 = vld [vmem:[%s5094_s2 + $0xa8] sm:$0xff]  ;;  %vm5366_vm8 = vcmask 1042432  }
 0x491   : >> { %vm5369_vm5 = vmmov %vm5366_vm8 }
 0x508   : >> { %v2371_v60 = vpop.f32.mrf.mxu0 }
 0x509   : >> { %v2388_v55 = vadd.f32 %v3410_v11, %v2371_v60 }
 0x50a   : >> { %v2373_v57 = vpop.f32.mrf.mxu0 }
 0x50b   : >> { %v2389_v8 = vadd.f32 %v3411_v53, %v2373_v57 }
 0x50c   : >> { %v2375_v33 = vpop.f32.mrf.mxu0 }
 0x50d   : >> { %v2390_v12 = vadd.f32 %v3412_v44, %v2375_v33 }
 0x50e   : >> { %v2377_v59 = vpop.f32.mrf.mxu0 }
 0x50f   : >> { %v2391_v40 = vadd.f32 %v3413_v50, %v2377_v59 }
 0x510   : >> { %v4987_v2 = vpop.f32.mrf.mxu0 }
 0x512   : >> { %v4989_v18 = vpop.f32.mrf.mxu0  ;;  %v2469_v5 = vpop.f32.mrf.mxu1 }
 0x513   : >> { %v2486_v32 = vadd.f32 %v2469_v5, %v2388_v55  ;;  %v5367_v55 = vld [vmem:[#allocation10_spill] sm:$0xff] }
 0x514   : >> { %v2385_v47 = vpop.f32.mrf.mxu0  ;;  %v2471_v63 = vpop.f32.mrf.mxu1  ;;  %v3176_v44 = vrot.slane %v5367_v55, 2 }
 0x515   : >> { %v2487_v46 = vadd.f32 %v2471_v63, %v2389_v8  ;;  %v2392_v47 = vadd.f32 %v3414_v21, %v4987_v2  ;;  %v5368_v8 = vrot.slane %v5367_v55, 5 }
 0x516   : >> { %v2386_v16 = vpop.f32.mrf.mxu0  ;;  %v2473_v19 = vpop.f32.mrf.mxu1 }
 0x517   : >> { %v2488_v60 = vadd.f32 %v2473_v19, %v2390_v12 }
 0x518   : >> { %v2475_v22 = vpop.f32.mrf.mxu1  ;;  %v2571_v35 = vpop.f32.mrf.mxu0 }
 0x519   : >> { %v2588_v49 = vadd.f32 %v2571_v35, %v2486_v32  ;;  %v2393_v35 = vadd.f32 %v3415_v42, %v4989_v18  ;;  %v3184_v32 = vsel %vm5369_vm5, %v5367_v55, %v5368_v8 }
 0x51a   : >> { %v2479_v23 = vpop.f32.mrf.mxu1  ;;  %v2573_v7 = vpop.f32.mrf.mxu0 }
 0x51b   : >> { %v2589_v57 = vadd.f32 %v2573_v7, %v2487_v46 }
 0x51c   : >> { %v4991_v24 = vpop.f32.mrf.mxu1  ;;  %v2575_v1 = vpop.f32.mrf.mxu0 }
 0x51d   : >> { %v2491_v7 = vadd.f32 %v4991_v24, %v2393_v35 }
 0x51e   : >> { %v2483_v37 = vpop.f32.mrf.mxu1  ;;  %v2577_v9 = vpop.f32.mrf.mxu0 }
 0x51f   : >> { %v2489_v37 = vadd.f32 %v2475_v22, %v2391_v40  ;;  %v3626_v22 = vld [vmem:[%s3921_s16] sm:$0x77]  ;;  %s3459_s16 = sshll.u32 %s3735_s30, 5  ;;  %s5374_s30 = smov %s3914_s11 }
 0x520   : >> { %v2484_v31 = vpop.f32.mrf.mxu1  ;;  %v4993_v52 = vpop.f32.mrf.mxu0  ;;  %v3175_v53 = vrot.slane %v3626_v22, 2  ;;  %v3179_v46 = vrot.slane %v3626_v22, 7  ;;  %s5058_s18 = scalar_lea.vmem %s3809_s29, %s3459_s16 }
 0x521   : >> { %v2590_v31 = vadd.f32 %v2575_v1, %v2488_v60  ;;  %v5364_v1 = vld [vmem:[#allocation9_spill] sm:$0xff]  ;;  %v3180_v60 = vrot.slane %v5367_v55, 7 }
 0x522   : >> { %v4995_v41 = vpop.f32.mrf.mxu0  ;;  %v2673_v10 = vpop.f32.mrf.mxu1 }
 0x523   : >> { %v2690_v5 = vadd.f32 %v2673_v10, %v2588_v49 }
 0x524   : >> { %v2585_v54 = vpop.f32.mrf.mxu0  ;;  %v2675_v48 = vpop.f32.mrf.mxu1 }
 0x525   : >> { %v2691_v54 = vadd.f32 %v2675_v48, %v2589_v57  ;;  %v5365_v48 = vrot.slane %v5364_v1, 5 }
 0x526   : >> { %v2586_v17 = vpop.f32.mrf.mxu0  ;;  %v2677_v4 = vpop.f32.mrf.mxu1 }
 0x527   : >> { %v2490_v17 = vadd.f32 %v2479_v23, %v2392_v47  ;;  %v3183_v18 = vsel %vm5366_vm8, %v3626_v22, %v5365_v48 }
 0x528   : >> { %v4997_v26 = vpop.f32.mrf.mxu1  ;;  %v2751_v61 = vpop.f32.mrf.mxu0  ;;  %v3185_v21 = vsel %vm5370_vm6, %v3183_v18, %v3175_v53 }
 0x529   : >> { %v2768_v63 = vadd.f32 %v2751_v61, %v2690_v5  ;;  %v2592_v2 = vadd.f32 %v4993_v52, %v2490_v17 }
 0x52a   : >> { %v4999_v6 = vpop.f32.mrf.mxu1  ;;  %v2753_v20 = vpop.f32.mrf.mxu0 }
 0x52b   : >> { %v2769_v11 = vadd.f32 %v2753_v20, %v2691_v54  ;;  %v2593_v20 = vadd.f32 %v4995_v41, %v2491_v7  ;;  %v2694_v24 = vadd.f32 %v4999_v6, %v2592_v2 }
 0x52c   : >> { %v5001_v0 = vpop.f32.mrf.mxu1  ;;  %v2755_v51 = vpop.f32.mrf.mxu0 }
 0x52d   : >> { %v2695_v41 = vadd.f32 %v5001_v0, %v2593_v20 }
 0x52e   : >> { %v2687_v15 = vpop.f32.mrf.mxu1  ;;  %v5003_v62 = vpop.f32.mrf.mxu0 }
 0x530   : >> { %v2688_v38 = vpop.f32.mrf.mxu1  ;;  %v5005_v29 = vpop.f32.mrf.mxu0 }
 0x531   : >> { %v2591_v38 = vadd.f32 %v2577_v9, %v2489_v37  ;;  %v2772_v6 = vadd.f32 %v5005_v29, %v2694_v24  ;;  %v3186_v29 = vsel %vm5371_vm13, %v3184_v32, %v3176_v44 }
 0x532   : >> { %v5007_v3 = vpop.f32.mrf.mxu0  ;;  %v2853_v13 = vpop.f32.mrf.mxu1 }
 0x533   : >> { %v2870_v19 = vadd.f32 %v2853_v13, %v2768_v63  ;;  %v2693_v23 = vadd.f32 %v4997_v26, %v2591_v38 }
 0x534   : >> { %v2765_v43 = vpop.f32.mrf.mxu0  ;;  %v2855_v39 = vpop.f32.mrf.mxu1 }
 0x535   : >> { %v2692_v43 = vadd.f32 %v2677_v4, %v2590_v31  ;;  %v2871_v9 = vadd.f32 %v2855_v39, %v2769_v11  ;;  %v2771_v50 = vadd.f32 %v5003_v62, %v2693_v23  ;;  %v2773_v62 = vadd.f32 %v5007_v3, %v2695_v41 }
 0x536   : >> { %v2766_v25 = vpop.f32.mrf.mxu0  ;;  %v2857_v58 = vpop.f32.mrf.mxu1 }
 0x537   : >> { %v2770_v61 = vadd.f32 %v2755_v51, %v2692_v43 }
 0x538   : >> { %v5015_v56 = vpop.f32.mrf.mxu1  ;;  %v2955_v28 = vpop.f32.mrf.mxu0 }
 0x539   : >> { %v2972_v4 = vadd.f32 %v2955_v28, %v2870_v19  ;;  %v2872_v12 = vadd.f32 %v2857_v58, %v2770_v61  ;;  %v2873_v49 = vadd.f32 %v5015_v56, %v2771_v50 }
 0x53a   : >> { %v5020_v14 = vpop.f32.mrf.mxu1  ;;  %v2957_v30 = vpop.f32.mrf.mxu0 }
 0x53b   : >> { %v2973_v26 = vadd.f32 %v2957_v30, %v2871_v9  ;;  %v2874_v58 = vadd.f32 %v5020_v14, %v2772_v6  ;;  %v3187_v14 = vsel %vm5372_vm9, %v3175_v53, %v3179_v46 }
 0x53c   : >> { %v5025_v34 = vpop.f32.mrf.mxu1  ;;  %v2959_v36 = vpop.f32.mrf.mxu0 }
 0x53e   : >> { %v2867_v45 = vpop.f32.mrf.mxu1  ;;  %v2961_v27 = vpop.f32.mrf.mxu0 }
 0x53f   : >> { %v2974_v45 = vadd.f32 %v2959_v36, %v2872_v12  ;;  %v2975_v57 = vadd.f32 %v2961_v27, %v2873_v49  ;;  %v2875_v36 = vadd.f32 %v5025_v34, %v2773_v62  ;;  %v3188_v27 = vsel %vm5373_vm11, %v3176_v44, %v3180_v60 }
 0x540   : >> { %v2868_v16 = vpop.f32.mrf.mxu1  ;;  %v2965_v33 = vpop.f32.mrf.mxu0 }
 0x541   : >> { %v2976_v37 = vadd.f32 %v2965_v33, %v2874_v58 }
 0x542   : >> { %v2967_v59 = vpop.f32.mrf.mxu0  ;;  %v3049_v15 = vpop.f32.mrf.mxu1 }
 0x543   : >> { %v3066_v51 = vadd.f32 %v3049_v15, %v2972_v4  ;;  %v2977_v63 = vadd.f32 %v2967_v59, %v2875_v36 }
 0x544   : >> { %v2969_v10 = vpop.f32.mrf.mxu0  ;;  %v3051_v25 = vpop.f32.mrf.mxu1 }
 0x545   : >> { %v3067_v40 = vadd.f32 %v3051_v25, %v2973_v26 }
 0x546   : >> { %v2970_v13 = vpop.f32.mrf.mxu0  ;;  %v3053_v52 = vpop.f32.mrf.mxu1 }
 0x547   : >> { %v3068_v5 = vadd.f32 %v3053_v52, %v2974_v45 }
 0x548   : >> { %v3055_v39 = vpop.f32.mrf.mxu1  ;;  %v3151_v28 = vpop.f32.mrf.mxu0 }
 0x549   : >> { %v3168_v42 = vadd.f32 %v3151_v28, %v3066_v51  ;;  %v3069_v31 = vadd.f32 %v3055_v39, %v2975_v57 }
 0x54a   : >> { %v3059_v0 = vpop.f32.mrf.mxu1  ;;  %v3153_v30 = vpop.f32.mrf.mxu0 }
 0x54b   : >> { %v3189_v16 = vadd.f32 %v3185_v21, %v3168_v42   ;;  %v3169_v56 = vadd.f32 %v3153_v30, %v3067_v40  ;;  %v3070_v38 = vadd.f32 %v3059_v0, %v2976_v37 }
 0x54c   : >> { %v3061_v47 = vpop.f32.mrf.mxu1  ;;  %v3155_v3 = vpop.f32.mrf.mxu0 }
 0x54d   : >> { %3200 = vst [vmem:[%s5058_s18] sm:$0xff] %v3189_v16  ;;  %v3190_v15 = vadd.f32 %v3186_v29, %v3169_v56   ;;  %v3170_v54 = vadd.f32 %v3155_v3, %v3068_v5  ;;  %v3071_v19 = vadd.f32 %v3061_v47, %v2977_v63 }
 0x54e   : >> { %v3157_v35 = vpop.f32.mrf.mxu0  ;;  %v3063_v17 = vpop.f32.mrf.mxu1 }
 0x54f   : >> { %3201 = vst [vmem:[%s5058_s18 + $0x8] sm:$0xff] %v3190_v15  ;;  %v3191_v14 = vadd.f32 %v3187_v14, %v3170_v54   ;;  %v3193_v12 = vmax.f32 %v3170_v54, 0.0   ;;  %v3171_v34 = vadd.f32 %v3157_v35, %v3069_v31 }
 0x550   : >> { %v3161_v43 = vpop.f32.mrf.mxu0  ;;  %v3064_v11 = vpop.f32.mrf.mxu1 }
 0x551   : >> { %3202 = vst [vmem:[%s5058_s18 + $0x10] sm:$0xf] %v3191_v14  ;;  %v3192_v13 = vadd.f32 %v3188_v27, %v3171_v34   ;;  %v3194_v11 = vmax.f32 %v3171_v34, 0.0   ;;  %v3172_v33 = vadd.f32 %v3161_v43, %v3070_v38 }
 0x552   : >> { %v3163_v7 = vpop.f32.mrf.mxu0  ;;  %224 = sbr.rel (!%p222_p3) target bundleno = 38 (0x26), region = 106 }
 0x553   : >> { %3203 = vst [vmem:[%s5058_s18 + $0x18] sm:$0xf] %v3192_v13  ;;  %v3195_v10 = vmax.f32 %v3172_v33, 0.0   ;;  %v3173_v59 = vadd.f32 %v3163_v7, %v3071_v19 }
 0x554   : >> { %v3165_v2 = vpop.f32.mrf.mxu0 }
 0x555   : >> { %v3196_v9 = vmax.f32 %v3173_v59, 0.0  }
 0x556   : >> { %v3166_v25 = vpop.f32.mrf.mxu0 }
 0x557 PF: > { %s14_s12 = sadd.s32 1, %s3699_s12  }
 0x558   : > { %p11_p4 = scmp.ge.s32.totalorder %s14_s12, 4  }
 0x55a   :  { %13 = sbr.rel (!%p11_p4) target bundleno = 1 (0x1), region = 117 }
 0x55f   :  { %3225 = vsyncpa [#allocation3], 1 }
 0x560   :  { %3227 = vsyncpa [#allocation3 + $0x1], 1 }

</bundles_post_ra>
